<compile_context>
chip_gen: v5e
topology: v5e:2x2
jax: 0.10.0
libtpu: 0.0.40
codegen_flags: <defaults>
</compile_context>

<pallas_src>
import jax
import jax.numpy as jnp
from jax.experimental import pallas as pl
from jax.experimental.pallas import tpu as pltpu


def _pam_kernel(x_ref, wq_ref, bq_ref, wk_ref, bk_ref, wv_ref, bv_ref,
                g_ref, o_ref):
    # x_ref: (1, C, HW); weights: wq/wk (Cq, C), wv (C, C); biases (.., 1);
    # g_ref: (1, 1) gamma.
    x = x_ref[0]                                                  # (C, HW) f32

    # 1x1 convs == channel matmuls on the MXU (lane-dense HW output width).
    q = jnp.dot(wq_ref[...], x, preferred_element_type=jnp.float32) + bq_ref[...]
    k = jnp.dot(wk_ref[...], x, preferred_element_type=jnp.float32) + bk_ref[...]
    v = jnp.dot(wv_ref[...], x, preferred_element_type=jnp.float32) + bv_ref[...]

    # energy[i, j] = sum_c q[c, i] * k[c, j]  -> (HW, HW)
    energy = jax.lax.dot_general(
        q, k, (((0,), (0,)), ((), ())), preferred_element_type=jnp.float32)

    # Numerically-stable softmax over the last (lane) axis.
    m = jnp.max(energy, axis=-1, keepdims=True)
    e = jnp.exp(energy - m)
    att = e / jnp.sum(e, axis=-1, keepdims=True)                  # (HW, HW)

    # out[c, i] = sum_j v[c, j] * att[i, j]  -> (C, HW)
    out = jax.lax.dot_general(
        v, att, (((1,), (1,)), ((), ())), preferred_element_type=jnp.float32)

    # gamma * out + x   (gamma broadcast from (1,1))
    o_ref[0] = g_ref[...] * out + x


def pam_module(x, wq, bq, wk, bk, wv, bv, gamma):
    """x: (N, C, H, W) f32; wq/wk: (C//8, C); wv: (C, C); gamma: scalar."""
    N, C, H, W = x.shape
    Cq = wq.shape[0]
    HW = H * W

    x_flat = x.reshape(N, C, HW)
    bq_c = bq.reshape(Cq, 1)
    bk_c = bk.reshape(Cq, 1)
    bv_c = bv.reshape(C, 1)
    g_c = jnp.asarray(gamma, jnp.float32).reshape(1, 1)

    flops_per_batch = (
        2 * HW * C * (2 * Cq + C)      # q, k, v projections
        + 2 * HW * HW * Cq             # energy = Q^T K
        + 2 * HW * HW * C              # V @ attention^T
        + 5 * HW * HW                  # softmax arithmetic
        + 2 * C * HW)                  # gamma * out + x
    cost = pl.CostEstimate(
        flops=N * flops_per_batch,
        transcendentals=N * HW * HW,                       # exp in softmax
        bytes_accessed=2 * N * C * HW * 4                  # read x + write out
        + (2 * Cq * C + C * C + 2 * Cq + C + 1) * 4)       # params

    out = pl.pallas_call(
        _pam_kernel,
        out_shape=jax.ShapeDtypeStruct((N, C, HW), x.dtype),
        grid_spec=pltpu.PrefetchScalarGridSpec(
            num_scalar_prefetch=0,
            grid=(N,),
            in_specs=[
                pl.BlockSpec((1, C, HW), lambda i: (i, 0, 0)),   # x slab
                pl.BlockSpec((Cq, C), lambda i: (0, 0)),         # wq
                pl.BlockSpec((Cq, 1), lambda i: (0, 0)),         # bq
                pl.BlockSpec((Cq, C), lambda i: (0, 0)),         # wk
                pl.BlockSpec((Cq, 1), lambda i: (0, 0)),         # bk
                pl.BlockSpec((C, C), lambda i: (0, 0)),          # wv
                pl.BlockSpec((C, 1), lambda i: (0, 0)),          # bv
                pl.BlockSpec((1, 1), lambda i: (0, 0)),          # gamma
            ],
            out_specs=pl.BlockSpec((1, C, HW), lambda i: (i, 0, 0)),
        ),
        compiler_params=pltpu.CompilerParams(
            dimension_semantics=("parallel",)),
        cost_estimate=cost,
    )(x_flat, wq, bq_c, wk, bk_c, wv, bv_c, g_c)
    return out.reshape(N, C, H, W)


def pam_module_ref(x, wq, bq, wk, bk, wv, bv, gamma):
    # Pure-JAX reference mirroring the PyTorch forward.
    N, C, H, W = x.shape
    HW = H * W
    xf = x.reshape(N, C, HW)
    q = jnp.einsum('qc,ncs->nqs', wq, xf) + bq[None, :, None]    # (N, Cq, HW)
    k = jnp.einsum('qc,ncs->nqs', wk, xf) + bk[None, :, None]    # (N, Cq, HW)
    v = jnp.einsum('oc,ncs->nos', wv, xf) + bv[None, :, None]    # (N, C,  HW)
    energy = jnp.einsum('nci,ncj->nij', q, k)                    # (N, HW, HW)
    att = jax.nn.softmax(energy, axis=-1)
    out = jnp.einsum('ncj,nij->nci', v, att)                     # (N, C, HW)
    out = gamma * out + xf
    return out.reshape(N, C, H, W)


if __name__ == "__main__":
    # Small shapes consistent with PAM_Module(in_dim=64): C//8 = 8, HW = 256.
    N, C, H, W = 2, 64, 16, 16
    Cq = C // 8

    key = jax.random.PRNGKey(0)
    ks = jax.random.split(key, 8)
    x = jax.random.normal(ks[0], (N, C, H, W), dtype=jnp.float32)
    wq = jax.random.normal(ks[1], (Cq, C), dtype=jnp.float32) * 0.1
    bq = jax.random.normal(ks[2], (Cq,), dtype=jnp.float32) * 0.1
    wk = jax.random.normal(ks[3], (Cq, C), dtype=jnp.float32) * 0.1
    bk = jax.random.normal(ks[4], (Cq,), dtype=jnp.float32) * 0.1
    wv = jax.random.normal(ks[5], (C, C), dtype=jnp.float32) * 0.1
    bv = jax.random.normal(ks[6], (C,), dtype=jnp.float32) * 0.1
    # PyTorch initializes gamma to 0 (output == x); use a nonzero value so the
    # attention path is actually exercised by the correctness check.
    gamma = jnp.float32(0.5)

    out = pam_module(x, wq, bq, wk, bk, wv, bv, gamma)
    jax.block_until_ready(out)

    ref = pam_module_ref(x, wq, bq, wk, bk, wv, bv, gamma)
    max_err = float(jnp.max(jnp.abs(out - ref)))
    assert jnp.allclose(out, ref, atol=2e-4, rtol=2e-4), max_err
    print("KERNEL_OK")
</pallas_src>

<mosaic_0001>
module attributes {stable_mosaic.version = 11 : i64} {
  func.func @_pam_kernel(%arg0: i32, %arg1: memref<1x64x256xf32, #tpu.memory_space<vmem>>, %arg2: memref<8x64xf32, #tpu.memory_space<vmem>>, %arg3: memref<8x1xf32, #tpu.memory_space<vmem>>, %arg4: memref<8x64xf32, #tpu.memory_space<vmem>>, %arg5: memref<8x1xf32, #tpu.memory_space<vmem>>, %arg6: memref<64x64xf32, #tpu.memory_space<vmem>>, %arg7: memref<64x1xf32, #tpu.memory_space<vmem>>, %arg8: memref<1x1xf32, #tpu.memory_space<vmem>>, %arg9: memref<1x64x256xf32, #tpu.memory_space<vmem>>) attributes {dimension_semantics = [#tpu.dimension_semantics<parallel>], iteration_bounds = array<i64: 2>, scalar_prefetch = 0 : i64, scratch_operands = 0 : i64, tpu.core_type = #tpu.core_type<tc>, window_params = [{transform_indices = @transform_0, window_bounds = array<i64: 1, 64, 256>}, {pipeline_mode = #tpu.pipeline_mode<synchronous>, transform_indices = @transform_1, window_bounds = array<i64: 8, 64>}, {pipeline_mode = #tpu.pipeline_mode<synchronous>, transform_indices = @transform_2, window_bounds = array<i64: 8, 1>}, {pipeline_mode = #tpu.pipeline_mode<synchronous>, transform_indices = @transform_3, window_bounds = array<i64: 8, 64>}, {pipeline_mode = #tpu.pipeline_mode<synchronous>, transform_indices = @transform_4, window_bounds = array<i64: 8, 1>}, {pipeline_mode = #tpu.pipeline_mode<synchronous>, transform_indices = @transform_5, window_bounds = array<i64: 64, 64>}, {pipeline_mode = #tpu.pipeline_mode<synchronous>, transform_indices = @transform_6, window_bounds = array<i64: 64, 1>}, {pipeline_mode = #tpu.pipeline_mode<synchronous>, transform_indices = @transform_7, window_bounds = array<i64: 1, 1>}, {transform_indices = @transform_8, window_bounds = array<i64: 1, 64, 256>}]} {
    %c0 = arith.constant 0 : index
    %c0_0 = arith.constant 0 : index
    %c0_1 = arith.constant 0 : index
    %0 = vector.load %arg1[%c0, %c0_0, %c0_1] : memref<1x64x256xf32, #tpu.memory_space<vmem>>, vector<1x64x256xf32>
    %1 = vector.shape_cast %0 : vector<1x64x256xf32> to vector<64x256xf32>
    %c0_2 = arith.constant 0 : index
    %c0_3 = arith.constant 0 : index
    %2 = vector.load %arg2[%c0_2, %c0_3] : memref<8x64xf32, #tpu.memory_space<vmem>>, vector<8x64xf32>
    %cst = arith.constant dense<0.000000e+00> : vector<8x256xf32>
    %3 = tpu.matmul %2, %1, %cst {dimension_numbers = #tpu.dot_dimension_numbers<[1], [0], [0], [1], [0, 0, 1, 1], [], []>} : vector<8x64xf32>, vector<64x256xf32>, vector<8x256xf32> -> vector<8x256xf32>
    %c0_4 = arith.constant 0 : index
    %c0_5 = arith.constant 0 : index
    %4 = vector.load %arg3[%c0_4, %c0_5] : memref<8x1xf32, #tpu.memory_space<vmem>>, vector<8x1xf32>
    %5 = vector.broadcast %4 : vector<8x1xf32> to vector<8x256xf32>
    %6 = arith.addf %3, %5 : vector<8x256xf32>
    %c0_6 = arith.constant 0 : index
    %c0_7 = arith.constant 0 : index
    %7 = vector.load %arg4[%c0_6, %c0_7] : memref<8x64xf32, #tpu.memory_space<vmem>>, vector<8x64xf32>
    %cst_8 = arith.constant dense<0.000000e+00> : vector<8x256xf32>
    %8 = tpu.matmul %7, %1, %cst_8 {dimension_numbers = #tpu.dot_dimension_numbers<[1], [0], [0], [1], [0, 0, 1, 1], [], []>} : vector<8x64xf32>, vector<64x256xf32>, vector<8x256xf32> -> vector<8x256xf32>
    %c0_9 = arith.constant 0 : index
    %c0_10 = arith.constant 0 : index
    %9 = vector.load %arg5[%c0_9, %c0_10] : memref<8x1xf32, #tpu.memory_space<vmem>>, vector<8x1xf32>
    %10 = vector.broadcast %9 : vector<8x1xf32> to vector<8x256xf32>
    %11 = arith.addf %8, %10 : vector<8x256xf32>
    %c0_11 = arith.constant 0 : index
    %c0_12 = arith.constant 0 : index
    %12 = vector.load %arg6[%c0_11, %c0_12] : memref<64x64xf32, #tpu.memory_space<vmem>>, vector<64x64xf32>
    %cst_13 = arith.constant dense<0.000000e+00> : vector<64x256xf32>
    %13 = tpu.matmul %12, %1, %cst_13 {dimension_numbers = #tpu.dot_dimension_numbers<[1], [0], [0], [1], [0, 0, 1, 1], [], []>} : vector<64x64xf32>, vector<64x256xf32>, vector<64x256xf32> -> vector<64x256xf32>
    %c0_14 = arith.constant 0 : index
    %c0_15 = arith.constant 0 : index
    %14 = vector.load %arg7[%c0_14, %c0_15] : memref<64x1xf32, #tpu.memory_space<vmem>>, vector<64x1xf32>
    %15 = vector.broadcast %14 : vector<64x1xf32> to vector<64x256xf32>
    %16 = arith.addf %13, %15 : vector<64x256xf32>
    %cst_16 = arith.constant dense<0.000000e+00> : vector<256x256xf32>
    %17 = tpu.matmul %6, %11, %cst_16 {dimension_numbers = #tpu.dot_dimension_numbers<[0], [0], [1], [1], [0, 1, 1, 1], [], []>} : vector<8x256xf32>, vector<8x256xf32>, vector<256x256xf32> -> vector<256x256xf32>
    %cst_17 = arith.constant dense<0xFF800000> : vector<256xf32>
    %18 = vector.multi_reduction <maximumf>, %17, %cst_17 [1] : vector<256x256xf32> to vector<256xf32>
    %19 = vector.shape_cast %18 : vector<256xf32> to vector<256x1xf32>
    %20 = vector.broadcast %19 : vector<256x1xf32> to vector<256x256xf32>
    %21 = arith.subf %17, %20 : vector<256x256xf32>
    %22 = math.exp %21 : vector<256x256xf32>
    %cst_18 = arith.constant dense<0.000000e+00> : vector<256xf32>
    %23 = vector.multi_reduction <add>, %22, %cst_18 [1] : vector<256x256xf32> to vector<256xf32>
    %24 = vector.shape_cast %23 : vector<256xf32> to vector<256x1xf32>
    %25 = vector.broadcast %24 : vector<256x1xf32> to vector<256x256xf32>
    %26 = arith.divf %22, %25 : vector<256x256xf32>
    %cst_19 = arith.constant dense<0.000000e+00> : vector<64x256xf32>
    %27 = tpu.matmul %16, %26, %cst_19 {dimension_numbers = #tpu.dot_dimension_numbers<[1], [1], [0], [0], [0, 0, 1, 0], [], []>} : vector<64x256xf32>, vector<256x256xf32>, vector<64x256xf32> -> vector<64x256xf32>
    %c0_20 = arith.constant 0 : index
    %c0_21 = arith.constant 0 : index
    %28 = vector.load %arg8[%c0_20, %c0_21] : memref<1x1xf32, #tpu.memory_space<vmem>>, vector<1x1xf32>
    %29 = vector.broadcast %28 : vector<1x1xf32> to vector<64x256xf32>
    %30 = arith.mulf %29, %27 : vector<64x256xf32>
    %31 = arith.addf %30, %1 : vector<64x256xf32>
    %c0_22 = arith.constant 0 : index
    %c0_23 = arith.constant 0 : index
    %c0_24 = arith.constant 0 : index
    %32 = vector.load %arg9[%c0_22, %c0_23, %c0_24] : memref<1x64x256xf32, #tpu.memory_space<vmem>>, vector<1x64x256xf32>
    %33 = vector.shape_cast %32 : vector<1x64x256xf32> to vector<64x256xf32>
    %34 = vector.shape_cast %31 : vector<64x256xf32> to vector<1x64x256xf32>
    tpu.vector_store %arg9[%c0_22, %c0_23, %c0_24], %34 {strides = array<i32>} : memref<1x64x256xf32, #tpu.memory_space<vmem>>, vector<1x64x256xf32>,
    return
  }
  func.func @transform_0(%arg0: i32) -> (i32, i32, i32) {
    %c0_i32 = arith.constant 0 : i32
    %c0_i32_0 = arith.constant 0 : i32
    %c0_i32_1 = arith.constant 0 : i32
    return %arg0, %c0_i32, %c0_i32_0 : i32, i32, i32
  }
  func.func @transform_1(%arg0: i32) -> (i32, i32) {
    %c0_i32 = arith.constant 0 : i32
    %c0_i32_0 = arith.constant 0 : i32
    %c0_i32_1 = arith.constant 0 : i32
    return %c0_i32, %c0_i32_0 : i32, i32
  }
  func.func @transform_2(%arg0: i32) -> (i32, i32) {
    %c0_i32 = arith.constant 0 : i32
    %c0_i32_0 = arith.constant 0 : i32
    %c0_i32_1 = arith.constant 0 : i32
    return %c0_i32, %c0_i32_0 : i32, i32
  }
  func.func @transform_3(%arg0: i32) -> (i32, i32) {
    %c0_i32 = arith.constant 0 : i32
    %c0_i32_0 = arith.constant 0 : i32
    %c0_i32_1 = arith.constant 0 : i32
    return %c0_i32, %c0_i32_0 : i32, i32
  }
  func.func @transform_4(%arg0: i32) -> (i32, i32) {
    %c0_i32 = arith.constant 0 : i32
    %c0_i32_0 = arith.constant 0 : i32
    %c0_i32_1 = arith.constant 0 : i32
    return %c0_i32, %c0_i32_0 : i32, i32
  }
  func.func @transform_5(%arg0: i32) -> (i32, i32) {
    %c0_i32 = arith.constant 0 : i32
    %c0_i32_0 = arith.constant 0 : i32
    %c0_i32_1 = arith.constant 0 : i32
    return %c0_i32, %c0_i32_0 : i32, i32
  }
  func.func @transform_6(%arg0: i32) -> (i32, i32) {
    %c0_i32 = arith.constant 0 : i32
    %c0_i32_0 = arith.constant 0 : i32
    %c0_i32_1 = arith.constant 0 : i32
    return %c0_i32, %c0_i32_0 : i32, i32
  }
  func.func @transform_7(%arg0: i32) -> (i32, i32) {
    %c0_i32 = arith.constant 0 : i32
    %c0_i32_0 = arith.constant 0 : i32
    %c0_i32_1 = arith.constant 0 : i32
    return %c0_i32, %c0_i32_0 : i32, i32
  }
  func.func @transform_8(%arg0: i32) -> (i32, i32, i32) {
    %c0_i32 = arith.constant 0 : i32
    %c0_i32_0 = arith.constant 0 : i32
    %c0_i32_1 = arith.constant 0 : i32
    return %arg0, %c0_i32, %c0_i32_0 : i32, i32, i32
  }
}

</mosaic_0001>

<bundles_post_ra>
// kernel: tpu_custom_call.1
= control target key start
LH: loop header
LB: loop body
LE: loop exit
PB: predicated region body
PF: predicated region fallthrough
CT: control target
= control target key end

     0   :  { %s4296_s0 = inlined_call_operand.hbm [shape: f32[2,64,256], index: 0, kind: input, shape index: {}]   ;;  %s4297_s1 = inlined_call_operand.vmem [shape: f32[8,64], index: 1, kind: input, shape index: {}]   ;;  %s4298_s2 = inlined_call_operand.vmem [shape: f32[8,1], index: 2, kind: input, shape index: {}]   ;;  %s4299_s3 = inlined_call_operand.vmem [shape: f32[8,64], index: 3, kind: input, shape index: {}]   ;;  %s4300_s4 = inlined_call_operand.vmem [shape: f32[8,1], index: 4, kind: input, shape index: {}]   ;;  %s4301_s5 = inlined_call_operand.vmem [shape: f32[64,64], index: 5, kind: input, shape index: {}]   ;;  %s4302_s6 = inlined_call_operand.vmem [shape: f32[64,1], index: 6, kind: input, shape index: {}]   ;;  %s4303_s7 = inlined_call_operand.<no memory space> [shape: f32[1,1], index: 7, kind: input, shape index: {}]   ;;  %s4304_s8 = inlined_call_operand.hbm [shape: f32[2,64,256], index: 8, kind: output, shape index: {}]  }
   0x1   :  { %v13_v0 = vstv %s4303_s7 }
   0x2   :  { %14 = vst [vmem:[#allocation2] sm:$0x1] %v13_v0 }
   0x3   :  { %15 = vsyncpa [#allocation4], 0 }
   0x4   :  { %17 = vsyncpa [#allocation4 + $0x1], 0 }
   0x5   :  { %18 = vsyncpa [#allocation5], 0 }
   0x6   :  { %20 = vsyncpa [#allocation5 + $0x1], 0  ;;  %s2713_s29 = smov 0   ;;  %s2715_s30 = smov 0  }
   0x7   :  { %s2717_s9 = smov 0   ;;  %s2719_s10 = smov 0  }
   0x8 LB: > { %s2734_s7 = sadd.s32 4294967295, %s2658_s10   ;;  %s2198_s11 = sadd.s32 4294967294, %s2658_s10   ;;  %s2658_s10 = sphi %s2719_s10, %s4505_s10   ;;  %s2654_s9 = sphi %s2717_s9, %s4504_s9   ;;  %s2650_s30 = sphi %s2715_s30, %s4503_s30   ;;  %s2646_s29 = sphi %s2713_s29, %s4502_s29  }
   0x9   : > { %s2738_s12 = sadd.s32 1, %s2658_s10   ;;  %s33_s13 = sadd.s32 1, %s2654_s9 }
   0xa   : > { %s30_s14 = ssub.s32 %s2658_s10, %s2738_s12  ;;  %p40_p0 = scmp.ne.s32.totalorder %s2654_s9, %s2650_s30 }
   0xb   : > { %p31_p1 = scmp.eq.s32.totalorder %s30_s14, 0  ;;  %p41_p2 = scmp.eq.s32.totalorder %s2658_s10, 0 }
   0xc   : > { %p46_p3 = scmp.ne.s32.totalorder %s2650_s30, %s2646_s29  ;;  %p47_p4 = scmp.eq.s32.totalorder %s2734_s7, 0 }
   0xd   : > { %s2750_s15 = scalar_select %p31_p1, %s2654_s9, %s33_s13  }
   0xe   : > { %p2752_p5 = por %p41_p2, %p40_p0  ;;  %p2756_p6 = por %p47_p4, %p46_p3 }
   0xf   : > { %4352 = sst [smem:[#allocation9_spill]] %s2750_s15  ;;  %p217_p7 = scmp.eq.s32.totalorder %s2734_s7, 1 }
  0x10   : > { %p223_p8 = scmp.eq.s32.totalorder %s2198_s11, 1  ;;  %p2310_p10 = scmp.lt.s32.totalorder %s2658_s10, 2 }
  0x11   : > { %p2763_p11 = por %p217_p7, %p40_p0  ;;  %s264_s20 = sand.u32 1, %s2654_s9  }
  0x12   : > { %p2767_p12 = por %p223_p8, %p46_p3  ;;  %s2296_s21 = sshll.u32 %s2658_s10, 7 }
  0x13   : > { %s2201_s22 = sshll.u32 %s264_s20, 7  ;;  %s273_s25 = scalar_lea.hbm %s4296_s0, %s2296_s21 }
  0x14   : > { %s274_s26 = sshll.u32 %s273_s25, 4  ;;  %s268_s27 = scalar_lea.vmem [#allocation3], %s2201_s22  ;;  %s275_s26 = int_to_ptr.hbm [resolvable:$true] %s274_s26 }
  0x15   : > { %s276_s28 = sshll.u32 %s268_s27, 4  ;;  %p2778_p13 = pnand %p2310_p10, %p2752_p5  ;;  %s277_s28 = int_to_ptr.vmem [resolvable:$true] %s276_s28 }
  0x16   : > { %p2204_p0 = scmp.ge.s32.totalorder %s2658_s10, 1  ;;  %p284_p1 = scmp.lt.s32.totalorder %s2658_s10, 3 }
  0x17   : > { %s265_s13 = scalar_lea.sflag [#allocation4], %s264_s20  ;;  %s2562_s14 = sshra.s32 %s275_s26, 4  ;;  %s2563_s14 = int_to_ptr.hbm [resolvable:$true] %s2562_s14 }
  0x18   : > { %s2564_s15 = scalar_lea.hbm %s2563_s14, 128  ;;  %p2566_p3 = pneg %p2778_p13 }
  0x19   : > { %p2565_p2 = scmp.ne.s32.totalorder %s2563_s14, %s2564_s15  ;;  %s2569_s16 = scalar_lea.hbm %s4296_s0, 256 }
  0x1a   : > { %p2570_p5 = scmp.lt.s32.totalorder %s2563_s14, %s4296_s0  ;;  %p2571_p8 = scmp.lt.s32.totalorder %s2569_s16, %s2564_s15 }
  0x1b   : > { %p2567_p4 = pnand %p2566_p3, %p2565_p2 }
  0x1c   : > { %p2572_p10 = por %p2571_p8, %p2570_p5 }
  0x1d   : > { %p2568_p7 = pneg %p2567_p4 }
  0x1f   : > { %p2573_p9 = pnand %p2572_p10, %p2568_p7 }
  0x21   : > { %2576 = shalt.err (!%p2573_p9)
}
  0x22   : > { %s2660_s20 = smov 256   ;;  %s2661_s25 = smov 16  }
  0x23   : > { %2305 = dma.hbm_to_vmem [thread:$0]  (!%p2778_p13), %s275_s26, 2048, %s277_s28, %s265_s13, %s2660_s20, %s2660_s20, %s2661_s25  }
  0x24   : > { %p285_p2 = pnand %p2204_p0, %p284_p1 }
  0x26   : > { %288 = sbr.rel (%p285_p2) target bundleno = 1394 (0x572), region = 52 }
  0x2b   : > { %s2799_s27 = sand.u32 1, %s2650_s30  }
  0x2c   : > { %s2205_s15 = sshll.u32 %s2799_s27, 7  ;;  %s291_s14 = scalar_lea.sflag [#allocation4], %s2799_s27 }
  0x2d   : > { %s2805_s21 = scalar_lea.vmem [#allocation3], %s2205_s15 }
  0x2e   : > { %2637 = dma.done.wait (%p2756_p6), %s291_s14, 2048  }
  0x2f   : > { %2639 = vsyncadd (%p2756_p6), %s291_s14, 4294965248  ;;  %v2662_v1 = vmov 0   ;;  %v342_v2 = vld [vmem:[%s2805_s21 + $0x70] sm:$0xff]  ;;  %v343_v3 = vld [vmem:[%s2805_s21 + $0x78] sm:$0xff]  ;;  %vm351_vm0 = vcmask 523264   ;;  %vm671_vm1 = vcmask 64512  }
  0x30   : > { %2350 = vset.pattern.permute.xlu0 %v2662_v1  ;;  %2351 = vset.pattern.permute.xlu2 %v2662_v1  ;;  %v340_v4 = vld [vmem:[%s2805_s21 + $0x60] sm:$0xff]  ;;  %v341_v5 = vld [vmem:[%s2805_s21 + $0x68] sm:$0xff]  ;;  %v338_v6 = vld [vmem:[%s2805_s21 + $0x50] sm:$0xff]  ;;  %s4202_s13 = scalar_lea.vmem [#allocation6], %s2205_s15  ;;  %s2297_s15 = sshll.u32 %s2734_s7, 7 }
  0x31   : > { %363 = vmatpush.msra.mxu0 %v342_v2  ;;  %383 = vmatpush.msra.mxu1 %v343_v3  ;;  %v339_v7 = vld [vmem:[%s2805_s21 + $0x58] sm:$0xff]  ;;  %v336_v8 = vld [vmem:[%s2805_s21 + $0x40] sm:$0xff]  ;;  %v337_v9 = vld [vmem:[%s2805_s21 + $0x48] sm:$0xff]  ;;  %s2121_s23 = scalar_lea.hbm %s4304_s8, %s2297_s15  ;;  %s2122_s24 = sshll.u32 %s4202_s13, 4  ;;  %s2123_s24 = int_to_ptr.vmem [resolvable:$true] %s2122_s24 }
  0x32   : > { %v345_v10 = vld [vmem:[%s4298_s2] sm:$0xff]  ;;  %v334_v11 = vld [vmem:[%s2805_s21 + $0x30] sm:$0xff]  ;;  %v333_v14 = vld [vmem:[%s2805_s21 + $0x28] sm:$0xff]  ;;  %s2124_s20 = sshll.u32 %s2121_s23, 4  ;;  %s2110_s7 = scalar_lea.sflag [#allocation5], %s2799_s27  ;;  %s2125_s20 = int_to_ptr.hbm [resolvable:$true] %s2124_s20 }
  0x33   : > { %364 = vmatpush.msra.mxu0 %v340_v4  ;;  %384 = vmatpush.msra.mxu1 %v341_v5  ;;  %v335_v12 = vld [vmem:[%s2805_s21 + $0x38] sm:$0xff]  ;;  %v332_v13 = vld [vmem:[%s2805_s21 + $0x20] sm:$0xff]  ;;  %v330_v15 = vld [vmem:[%s2805_s21 + $0x10] sm:$0xff]  ;;  %s2606_s25 = sshra.s32 %s2125_s20, 4  ;;  %s2612_s28 = scalar_lea.hbm %s4304_s8, 256  ;;  %s2607_s25 = int_to_ptr.hbm [resolvable:$true] %s2606_s25 }
  0x34   : > { %348 = vperm.xlu0 %2350, %v345_v10   ;;  %v331_v16 = vld [vmem:[%s2805_s21 + $0x18] sm:$0xff]  ;;  %v328_v18 = vld [vmem:[%s2805_s21] sm:$0xff]  ;;  %v329_v19 = vld [vmem:[%s2805_s21 + $0x8] sm:$0xff]  ;;  %s2608_s14 = scalar_lea.hbm %s2607_s25, 128  ;;  %p2613_p0 = scmp.lt.s32.totalorder %s2607_s25, %s4304_s8 }
  0x35   : > { %365 = vmatpush.msra.mxu0 %v338_v6  ;;  %385 = vmatpush.msra.mxu1 %v339_v7  ;;  %v396_v17 = vld [vmem:[%s4300_s4] sm:$0xff]  ;;  %p2609_p6 = scmp.ne.s32.totalorder %s2607_s25, %s2608_s14  ;;  %p2614_p1 = scmp.lt.s32.totalorder %s2612_s28, %s2608_s14 }
  0x36   : > { %v344_v20 = vld [vmem:[%s4297_s1] sm:$0xff] }
  0x37   : > { %366 = vmatpush.msra.mxu0 %v336_v8  ;;  %386 = vmatpush.msra.mxu1 %v337_v9  ;;  %v395_v21 = vld [vmem:[%s4299_s3] sm:$0xff]  ;;  %p2610_p9 = pnand %p2609_p6, %p2763_p11  ;;  %p2615_p3 = por %p2614_p1, %p2613_p0 }
  0x39   : > { %367 = vmatpush.msra.mxu0 %v334_v11  ;;  %387 = vmatpush.msra.mxu1 %v335_v12  ;;  %p2611_p13 = pneg %p2610_p9 }
  0x3b   : > { %368 = vmatpush.msra.mxu0 %v332_v13  ;;  %388 = vmatpush.msra.mxu1 %v333_v14  ;;  %p2616_p4 = pnand %p2615_p3, %p2611_p13 }
  0x3c   : > { %399 = vperm.xlu0 %2350, %v396_v17  }
  0x3d   : > { %369 = vmatpush.msra.mxu0 %v330_v15  ;;  %389 = vmatpush.msra.mxu1 %v331_v16 }
  0x3f   : > { %370 = vmatpush.msra.mxu0 %v328_v18  ;;  %390 = vmatpush.msra.mxu1 %v329_v19 }
  0x40   : > { %2207 = vmatmul.msk.f32.vlgmr.msra.gmra.mxu0 %vm351_vm0, %v344_v20  ;;  %2208 = vmatmul.msk.f32.vlgmr.msra.gmra.mxu1 %vm351_vm0, %v344_v20 }
  0x41   : > { %413 = vmatpush.msrb.mxu0 %v342_v2  ;;  %433 = vmatpush.msrb.mxu1 %v343_v3 }
  0x43   : > { %414 = vmatpush.msrb.mxu0 %v340_v4  ;;  %434 = vmatpush.msrb.mxu1 %v341_v5 }
  0x45   : > { %415 = vmatpush.msrb.mxu0 %v338_v6  ;;  %435 = vmatpush.msrb.mxu1 %v339_v7 }
  0x47   : > { %416 = vmatpush.msrb.mxu0 %v336_v8  ;;  %436 = vmatpush.msrb.mxu1 %v337_v9 }
  0x49   : > { %417 = vmatpush.msrb.mxu0 %v334_v11  ;;  %437 = vmatpush.msrb.mxu1 %v335_v12 }
  0x4b   : > { %418 = vmatpush.msrb.mxu0 %v332_v13  ;;  %438 = vmatpush.msrb.mxu1 %v333_v14 }
  0x4d   : > { %419 = vmatpush.msrb.mxu0 %v330_v15  ;;  %439 = vmatpush.msrb.mxu1 %v331_v16 }
  0x4f   : > { %420 = vmatpush.msrb.mxu0 %v328_v18  ;;  %440 = vmatpush.msrb.mxu1 %v329_v19 }
  0x50   : > { %2209 = vmatmul.msk.f32.vlgmr.msrb.gmra.mxu0 %vm351_vm0, %v395_v21  ;;  %2210 = vmatmul.msk.f32.vlgmr.msrb.gmra.mxu1 %vm351_vm0, %v395_v21 }
  0x51   : > { %533 = vmatpush.msra.mxu0 %v342_v2  ;;  %574 = vmatpush.msra.mxu1 %v343_v3 }
  0x53   : > { %534 = vmatpush.msra.mxu0 %v340_v4  ;;  %575 = vmatpush.msra.mxu1 %v341_v5 }
  0x55   : > { %535 = vmatpush.msra.mxu0 %v338_v6  ;;  %576 = vmatpush.msra.mxu1 %v339_v7 }
  0x57   : > { %536 = vmatpush.msra.mxu0 %v336_v8  ;;  %577 = vmatpush.msra.mxu1 %v337_v9 }
  0x59   : > { %537 = vmatpush.msra.mxu0 %v334_v11  ;;  %578 = vmatpush.msra.mxu1 %v335_v12 }
  0x5b   : > { %538 = vmatpush.msra.mxu0 %v332_v13  ;;  %579 = vmatpush.msra.mxu1 %v333_v14 }
  0x5d   : > { %539 = vmatpush.msra.mxu0 %v330_v15  ;;  %580 = vmatpush.msra.mxu1 %v331_v16 }
  0x5f   : > { %540 = vmatpush.msra.mxu0 %v328_v18  ;;  %581 = vmatpush.msra.mxu1 %v329_v19 }
  0xa6   : > { %v349_v22 = vpop.permute.xlu0 %348 }
  0xae   : > { %v400_v26 = vpop.permute.xlu0 %399 }
  0xbd   : > { %v372_v23 = vpop.f32.mrf.mxu0  ;;  %v392_v25 = vpop.f32.mrf.mxu1 }
  0xbe   : > { %v373_v24 = vadd.f32 %v372_v23, %v349_v22  ;;  %v393_v31 = vadd.f32 %v392_v25, %v349_v22 }
  0xc0   : > { %607 = vxpose.xlu1.b32.start.end [1/1] (short) %v373_v24, 128 }
  0xcd   : > { %v422_v27 = vpop.f32.mrf.mxu0  ;;  %v442_v28 = vpop.f32.mrf.mxu1 }
  0xce   : > { %v423_v29 = vadd.f32 %v422_v27, %v400_v26  ;;  %v443_v30 = vadd.f32 %v442_v28, %v400_v26 }
  0xd0   : > { %783 = vmatpush.msra.mxu2 %v423_v29  ;;  %896 = vmatpush.msra.mxu3 %v443_v30 }
 0x140   : > { %639 = vxpose.xlu1.b32.start.end [1/1] (short) %v393_v31, 128 }
 0x164   : > { %v623_v32 = vpop.trf.xlu1 }
 0x165   : > { %2227 = vmatmul.msk.f32.vlgmr.msra.gmra.mxu2 %vm671_vm1, %v623_v32  ;;  %2259 = vmatmul.msk.f32.vlgmr.msra.gmra.mxu3 %vm671_vm1, %v623_v32 }
 0x16c   : > { %v624_v33 = vpop.trf.xlu1 }
 0x16d   : > { %2228 = vmatmul.msk.f32.gmra.mxu2 %vm671_vm1, %v624_v33  ;;  %2260 = vmatmul.msk.f32.gmra.mxu3 %vm671_vm1, %v624_v33 }
 0x174   : > { %v625_v34 = vpop.trf.xlu1 }
 0x175   : > { %2229 = vmatmul.msk.f32.gmra.mxu2 %vm671_vm1, %v625_v34  ;;  %2261 = vmatmul.msk.f32.gmra.mxu3 %vm671_vm1, %v625_v34 }
 0x17c   : > { %v626_v35 = vpop.trf.xlu1 }
 0x17d   : > { %2230 = vmatmul.msk.f32.gmra.mxu2 %vm671_vm1, %v626_v35  ;;  %2262 = vmatmul.msk.f32.gmra.mxu3 %vm671_vm1, %v626_v35 }
 0x184   : > { %v627_v36 = vpop.trf.xlu1 }
 0x185   : > { %2231 = vmatmul.msk.f32.gmra.mxu2 %vm671_vm1, %v627_v36  ;;  %2263 = vmatmul.msk.f32.gmra.mxu3 %vm671_vm1, %v627_v36 }
 0x18c   : > { %v628_v37 = vpop.trf.xlu1 }
 0x18d   : > { %2232 = vmatmul.msk.f32.gmra.mxu2 %vm671_vm1, %v628_v37  ;;  %2264 = vmatmul.msk.f32.gmra.mxu3 %vm671_vm1, %v628_v37 }
 0x193   : > { %2352 = vset.pattern.permute.xlu1 %v2662_v1 }
 0x194   : > { %v629_v38 = vpop.trf.xlu1 }
 0x195   : > { %2233 = vmatmul.msk.f32.gmra.mxu2 %vm671_vm1, %v629_v38  ;;  %2265 = vmatmul.msk.f32.gmra.mxu3 %vm671_vm1, %v629_v38 }
 0x19c   : > { %v630_v39 = vpop.trf.xlu1 }
 0x19d   : > { %2234 = vmatmul.msk.f32.gmra.mxu2 %vm671_vm1, %v630_v39  ;;  %2266 = vmatmul.msk.f32.gmra.mxu3 %vm671_vm1, %v630_v39 }
 0x1a4   : > { %v631_v40 = vpop.trf.xlu1 }
 0x1a5   : > { %2235 = vmatmul.msk.f32.gmra.mxu2 %vm671_vm1, %v631_v40  ;;  %2267 = vmatmul.msk.f32.gmra.mxu3 %vm671_vm1, %v631_v40 }
 0x1ac   : > { %v632_v41 = vpop.trf.xlu1 }
 0x1ad   : > { %2236 = vmatmul.msk.f32.gmra.mxu2 %vm671_vm1, %v632_v41  ;;  %2268 = vmatmul.msk.f32.gmra.mxu3 %vm671_vm1, %v632_v41 }
 0x1b4   : > { %v633_v42 = vpop.trf.xlu1 }
 0x1b5   : > { %2237 = vmatmul.msk.f32.gmra.mxu2 %vm671_vm1, %v633_v42  ;;  %2269 = vmatmul.msk.f32.gmra.mxu3 %vm671_vm1, %v633_v42 }
 0x1bc   : > { %v634_v43 = vpop.trf.xlu1 }
 0x1bd   : > { %2238 = vmatmul.msk.f32.gmra.mxu2 %vm671_vm1, %v634_v43  ;;  %2270 = vmatmul.msk.f32.gmra.mxu3 %vm671_vm1, %v634_v43 }
 0x1c4   : > { %v635_v44 = vpop.trf.xlu1 }
 0x1c5   : > { %2239 = vmatmul.msk.f32.gmra.mxu2 %vm671_vm1, %v635_v44  ;;  %2271 = vmatmul.msk.f32.gmra.mxu3 %vm671_vm1, %v635_v44 }
 0x1cc   : > { %v636_v45 = vpop.trf.xlu1 }
 0x1cd   : > { %2240 = vmatmul.msk.f32.gmra.mxu2 %vm671_vm1, %v636_v45  ;;  %2272 = vmatmul.msk.f32.gmra.mxu3 %vm671_vm1, %v636_v45 }
 0x1d4   : > { %v637_v46 = vpop.trf.xlu1 }
 0x1d5   : > { %2241 = vmatmul.msk.f32.gmra.mxu2 %vm671_vm1, %v637_v46  ;;  %2273 = vmatmul.msk.f32.gmra.mxu3 %vm671_vm1, %v637_v46 }
 0x1dc   : > { %v638_v47 = vpop.trf.xlu1 }
 0x1dd   : > { %2242 = vmatmul.msk.f32.gmra.mxu2 %vm671_vm1, %v638_v47  ;;  %2274 = vmatmul.msk.f32.gmra.mxu3 %vm671_vm1, %v638_v47 }
 0x1e4   : > { %v655_v48 = vpop.trf.xlu1 }
 0x1e5   : > { %2243 = vmatmul.msk.f32.gmra.mxu2 %vm671_vm1, %v655_v48  ;;  %2275 = vmatmul.msk.f32.gmra.mxu3 %vm671_vm1, %v655_v48 }
 0x1e8   : > { %v2880_v49 = vpop.f32.mrf.mxu2  ;;  %v2882_v50 = vpop.f32.mrf.mxu3 }
 0x1e9   : > { %v994_v51 = vmax.f32 %v2880_v49, %v2882_v50 }
 0x1eb   : > { %995 = vmax.xlane.f32.xlu0 %v994_v51 }
 0x1ec   : > { %v656_v52 = vpop.trf.xlu1 }
 0x1ed   : > { %2244 = vmatmul.msk.f32.gmra.mxu2 %vm671_vm1, %v656_v52  ;;  %2276 = vmatmul.msk.f32.gmra.mxu3 %vm671_vm1, %v656_v52 }
 0x1f0   : > { %v2888_v53 = vpop.f32.mrf.mxu2  ;;  %v2890_v54 = vpop.f32.mrf.mxu3 }
 0x1f1   : > { %v997_v55 = vmax.f32 %v2888_v53, %v2890_v54 }
 0x1f3   : > { %998 = vmax.xlane.f32.xlu0 %v997_v55 }
 0x1f4   : > { %v657_v56 = vpop.trf.xlu1 }
 0x1f5   : > { %2245 = vmatmul.msk.f32.gmra.mxu2 %vm671_vm1, %v657_v56  ;;  %2277 = vmatmul.msk.f32.gmra.mxu3 %vm671_vm1, %v657_v56 }
 0x1f8   : > { %v2896_v57 = vpop.f32.mrf.mxu2  ;;  %v2898_v58 = vpop.f32.mrf.mxu3 }
 0x1f9   : > { %v1000_v59 = vmax.f32 %v2896_v57, %v2898_v58 }
 0x1fb   : > { %1001 = vmax.xlane.f32.xlu0 %v1000_v59 }
 0x1fc   : > { %v658_v60 = vpop.trf.xlu1 }
 0x1fd   : > { %2246 = vmatmul.msk.f32.gmra.mxu2 %vm671_vm1, %v658_v60  ;;  %2278 = vmatmul.msk.f32.gmra.mxu3 %vm671_vm1, %v658_v60 }
 0x200   : > { %v2904_v61 = vpop.f32.mrf.mxu2  ;;  %v2906_v62 = vpop.f32.mrf.mxu3 }
 0x201   : > { %v1003_v63 = vmax.f32 %v2904_v61, %v2906_v62 }
 0x203   : > { %1004 = vmax.xlane.f32.xlu2 %v1003_v63 }
 0x204   : > { %v659_v0 = vpop.trf.xlu1 }
 0x205   : > { %2247 = vmatmul.msk.f32.gmra.mxu2 %vm671_vm1, %v659_v0  ;;  %2279 = vmatmul.msk.f32.gmra.mxu3 %vm671_vm1, %v659_v0 }
 0x208   : > { %v2912_v1 = vpop.f32.mrf.mxu2  ;;  %v2914_v2 = vpop.f32.mrf.mxu3 }
 0x209   : > { %v1006_v3 = vmax.f32 %v2912_v1, %v2914_v2 }
 0x20b   : > { %1007 = vmax.xlane.f32.xlu0 %v1006_v3 }
 0x20c   : > { %v660_v4 = vpop.trf.xlu1 }
 0x20d   : > { %2248 = vmatmul.msk.f32.gmra.mxu2 %vm671_vm1, %v660_v4  ;;  %2280 = vmatmul.msk.f32.gmra.mxu3 %vm671_vm1, %v660_v4 }
 0x210   : > { %v2920_v5 = vpop.f32.mrf.mxu2  ;;  %v2922_v6 = vpop.f32.mrf.mxu3 }
 0x211   : > { %v1009_v7 = vmax.f32 %v2920_v5, %v2922_v6 }
 0x213   : > { %1010 = vmax.xlane.f32.xlu2 %v1009_v7 }
 0x214   : > { %v661_v8 = vpop.trf.xlu1 }
 0x215   : > { %2249 = vmatmul.msk.f32.gmra.mxu2 %vm671_vm1, %v661_v8  ;;  %2281 = vmatmul.msk.f32.gmra.mxu3 %vm671_vm1, %v661_v8 }
 0x218   : > { %v2928_v9 = vpop.f32.mrf.mxu2  ;;  %v2930_v10 = vpop.f32.mrf.mxu3 }
 0x219   : > { %v1012_v11 = vmax.f32 %v2928_v9, %v2930_v10 }
 0x21b   : > { %1013 = vmax.xlane.f32.xlu0 %v1012_v11 }
 0x21c   : > { %v662_v12 = vpop.trf.xlu1 }
 0x21d   : > { %2250 = vmatmul.msk.f32.gmra.mxu2 %vm671_vm1, %v662_v12  ;;  %2282 = vmatmul.msk.f32.gmra.mxu3 %vm671_vm1, %v662_v12 }
 0x220   : > { %v2936_v13 = vpop.f32.mrf.mxu2  ;;  %v2938_v14 = vpop.f32.mrf.mxu3 }
 0x221   : > { %v1015_v15 = vmax.f32 %v2936_v13, %v2938_v14 }
 0x223   : > { %1016 = vmax.xlane.f32.xlu2 %v1015_v15 }
 0x224   : > { %v663_v16 = vpop.trf.xlu1 }
 0x225   : > { %2251 = vmatmul.msk.f32.gmra.mxu2 %vm671_vm1, %v663_v16  ;;  %2283 = vmatmul.msk.f32.gmra.mxu3 %vm671_vm1, %v663_v16 }
 0x228   : > { %v2944_v17 = vpop.f32.mrf.mxu2  ;;  %v2946_v18 = vpop.f32.mrf.mxu3 }
 0x229   : > { %v1018_v19 = vmax.f32 %v2944_v17, %v2946_v18 }
 0x22b   : > { %1019 = vmax.xlane.f32.xlu2 %v1018_v19 }
 0x22c   : > { %v664_v41 = vpop.trf.xlu1 }
 0x22d   : > { %2252 = vmatmul.msk.f32.gmra.mxu2 %vm671_vm1, %v664_v41  ;;  %2284 = vmatmul.msk.f32.gmra.mxu3 %vm671_vm1, %v664_v41 }
 0x230   : > { %v2950_v20 = vpop.f32.mrf.mxu2  ;;  %v2952_v21 = vpop.f32.mrf.mxu3 }
 0x231   : > { %v1021_v22 = vmax.f32 %v2950_v20, %v2952_v21 }
 0x233   : > { %1022 = vmax.xlane.f32.xlu2 %v1021_v22 }
 0x234   : > { %v665_v44 = vpop.trf.xlu1 }
 0x235   : > { %2253 = vmatmul.msk.f32.gmra.mxu2 %vm671_vm1, %v665_v44  ;;  %2285 = vmatmul.msk.f32.gmra.mxu3 %vm671_vm1, %v665_v44 }
 0x238   : > { %v2956_v23 = vpop.f32.mrf.mxu2  ;;  %v2958_v24 = vpop.f32.mrf.mxu3 }
 0x239   : > { %v1024_v25 = vmax.f32 %v2956_v23, %v2958_v24 }
 0x23b   : > { %1025 = vmax.xlane.f32.xlu2 %v1024_v25 }
 0x23c   : > { %v666_v48 = vpop.trf.xlu1 }
 0x23d   : > { %2254 = vmatmul.msk.f32.gmra.mxu2 %vm671_vm1, %v666_v48  ;;  %2286 = vmatmul.msk.f32.gmra.mxu3 %vm671_vm1, %v666_v48 }
 0x240   : > { %v2962_v26 = vpop.f32.mrf.mxu2  ;;  %v2964_v27 = vpop.f32.mrf.mxu3 }
 0x241   : > { %v1027_v28 = vmax.f32 %v2962_v26, %v2964_v27 }
 0x243   : > { %1028 = vmax.xlane.f32.xlu2 %v1027_v28 }
 0x244   : > { %v667_v56 = vpop.trf.xlu1 }
 0x245   : > { %2255 = vmatmul.msk.f32.gmra.mxu2 %vm671_vm1, %v667_v56  ;;  %2287 = vmatmul.msk.f32.gmra.mxu3 %vm671_vm1, %v667_v56 }
 0x248   : > { %v2968_v29 = vpop.f32.mrf.mxu2  ;;  %v2970_v30 = vpop.f32.mrf.mxu3 }
 0x249   : > { %v1030_v31 = vmax.f32 %v2968_v29, %v2970_v30 }
 0x24b   : > { %1031 = vmax.xlane.f32.xlu2 %v1030_v31 }
 0x24c   : > { %v668_v63 = vpop.trf.xlu1 }
 0x24d   : > { %2256 = vmatmul.msk.f32.gmra.mxu2 %vm671_vm1, %v668_v63  ;;  %2288 = vmatmul.msk.f32.gmra.mxu3 %vm671_vm1, %v668_v63 }
 0x250   : > { %v2974_v32 = vpop.f32.mrf.mxu2  ;;  %v2976_v33 = vpop.f32.mrf.mxu3 }
 0x251   : > { %v1033_v34 = vmax.f32 %v2974_v32, %v2976_v33 }
 0x253   : > { %1034 = vmax.xlane.f32.xlu0 %v1033_v34 }
 0x254   : > { %v669_v8 = vpop.trf.xlu1 }
 0x255   : > { %2257 = vmatmul.msk.f32.gmra.mxu2 %vm671_vm1, %v669_v8  ;;  %2289 = vmatmul.msk.f32.gmra.mxu3 %vm671_vm1, %v669_v8 }
 0x258   : > { %v2980_v35 = vpop.f32.mrf.mxu2  ;;  %v2982_v36 = vpop.f32.mrf.mxu3 }
 0x259   : > { %v1036_v37 = vmax.f32 %v2980_v35, %v2982_v36 }
 0x25b   : > { %1037 = vmax.xlane.f32.xlu2 %v1036_v37 }
 0x25c   : > { %v670_v19 = vpop.trf.xlu1 }
 0x25d   : > { %2258 = vmatmul.msk.f32.gmra.mxu2 %vm671_vm1, %v670_v19  ;;  %2290 = vmatmul.msk.f32.gmra.mxu3 %vm671_vm1, %v670_v19 }
 0x25e   : > { %v3004_v47 = vpop.xlane.xlu0 %995 }
 0x260   : > { %v2986_v38 = vpop.f32.mrf.mxu2  ;;  %v2988_v39 = vpop.f32.mrf.mxu3 }
 0x261   : > { %4358 = vst [vmem:[#allocation10_spill] sm:$0xff] %v2988_v39  ;;  %v1039_v40 = vmax.f32 %v2986_v38, %v2988_v39 }
 0x263   : > { %1040 = vmax.xlane.f32.xlu2 %v1039_v40 }
 0x266   : > { %v3012_v55 = vpop.xlane.xlu0 %998 }
 0x268   : > { %v2994_v42 = vpop.f32.mrf.mxu2  ;;  %v2996_v43 = vpop.f32.mrf.mxu3 }
 0x26e   : > { %v3022_v0 = vpop.xlane.xlu0 %1001 }
 0x270   : > { %v3000_v45 = vpop.f32.mrf.mxu2  ;;  %v3002_v46 = vpop.f32.mrf.mxu3 }
 0x271   : > { %4359 = vst [vmem:[#allocation11_spill] sm:$0xff] %v3002_v46 }
 0x276   : > { %v3024_v3 = vpop.xlane.xlu2 %1004 }
 0x278   : > { %v3008_v51 = vpop.f32.mrf.mxu2  ;;  %v3010_v52 = vpop.f32.mrf.mxu3 }
 0x27e   : > { %v1008_v11 = vpop.xlane.xlu0 %1007 }
 0x280   : > { %v3016_v59 = vpop.f32.mrf.mxu2  ;;  %v3018_v60 = vpop.f32.mrf.mxu3 }
 0x286   : > { %v1011_v12 = vpop.xlane.xlu2 %1010 }
 0x288   : > { %v3026_v4 = vpop.f32.mrf.mxu2  ;;  %v3028_v7 = vpop.f32.mrf.mxu3 }
 0x28e   : > { %v1014_v22 = vpop.xlane.xlu0 %1013 }
 0x28f   : > { %v1102_v40 = vsub.f32 %v2928_v9, %v1014_v22  ;;  %v1103_v48 = vsub.f32 %v2930_v10, %v1014_v22  ;;  %v1100_v9 = vsub.f32 %v2920_v5, %v1011_v12 }
 0x290   : > { %v3032_v15 = vpop.f32.mrf.mxu2  ;;  %v3034_v16 = vpop.f32.mrf.mxu3 }
 0x291   : > { %v1178_v56 = vmul.f32 1.442695, %v1102_v40  ;;  %v1180_v63 = vmul.f32 1.442695, %v1103_v48 }
 0x296   : > { %v1017_v25 = vpop.xlane.xlu2 %1016 }
 0x297   : > { %v1104_v28 = vsub.f32 %v2936_v13, %v1017_v25  ;;  %v1105_v31 = vsub.f32 %v2938_v14, %v1017_v25 }
 0x298   : > { %v3040_v34 = vpop.f32.mrf.mxu2  ;;  %v3042_v37 = vpop.f32.mrf.mxu3 }
 0x299   : > { %v1182_v41 = vmul.f32 1.442695, %v1104_v28  ;;  %v1184_v44 = vmul.f32 1.442695, %v1105_v31  ;;  %v1101_v31 = vsub.f32 %v2922_v6, %v1011_v12  ;;  %v1098_v6 = vsub.f32 %v2912_v1, %v1008_v11 }
 0x29b   : > { %2354 = vpow2.f32 %v1182_v41  ;;  %v1176_v40 = vmul.f32 1.442695, %v1101_v31  ;;  %v1096_v31 = vsub.f32 %v2904_v61, %v3024_v3  ;;  %v1094_v61 = vsub.f32 %v2896_v57, %v3022_v0 }
 0x29c   : > { %2356 = vpow2.f32 %v1184_v44 }
 0x29d   : > { %2358 = vpow2.f32 %v1178_v56 }
 0x29e   : > { %v1020_v8 = vpop.xlane.xlu2 %1019  ;;  %2360 = vpow2.f32 %v1180_v63 }
 0x29f   : > { %v1106_v19 = vsub.f32 %v2944_v17, %v1020_v8  ;;  %v1107_v13 = vsub.f32 %v2946_v18, %v1020_v8  ;;  %v1174_v18 = vmul.f32 1.442695, %v1100_v9  ;;  %v1099_v8 = vsub.f32 %v2914_v2, %v1008_v11 }
 0x2a0   : > { %v3048_v14 = vpop.f32.mrf.mxu2  ;;  %v3050_v25 = vpop.f32.mrf.mxu3  ;;  %v1170_v9 = vmul.f32 1.442695, %v1098_v6  ;;  %v1097_v11 = vsub.f32 %v2906_v62, %v3024_v3  ;;  %v1095_v62 = vsub.f32 %v2898_v58, %v3022_v0  ;;  %v1092_v58 = vsub.f32 %v2888_v53, %v3012_v55 }
 0x2a1   : > { %v3052_v39 = vpop.eup %2354  ;;  %v1186_v28 = vmul.f32 1.442695, %v1106_v19  ;;  %v1188_v10 = vmul.f32 1.442695, %v1107_v13  ;;  %v1172_v1 = vmul.f32 1.442695, %v1099_v8  ;;  %v1063_v2 = vmax.f32 %v3048_v14, %v3050_v25 }
 0x2a2   : > { %4360 = vst [vmem:[#allocation12_spill] sm:$0xff] %v3052_v39  ;;  %v3055_v22 = vpop.eup %2356  ;;  %v1060_v8 = vmax.f32 %v3040_v34, %v3042_v37  ;;  %v1057_v0 = vmax.f32 %v3032_v15, %v3034_v16 }
 0x2a3   : > { %4361 = vst [vmem:[#allocation13_spill] sm:$0xff] %v3055_v22  ;;  %2362 = vpow2.f32 %v1186_v28  ;;  %v1303_v17 = vadd.f32 %v3055_v22, %v3052_v39  ;;  %v3060_v41 = vpop.eup %2358 }
 0x2a4   : > { %2364 = vpow2.f32 %v1188_v10  ;;  %4362 = vst [vmem:[#allocation14_spill] sm:$0xff] %v3060_v41  ;;  %v3062_v44 = vpop.eup %2360 }
 0x2a5   : > { %1304 = vadd.xlane.f32.xlu0 %v1303_v17  ;;  %4363 = vst [vmem:[#allocation15_spill] sm:$0xff] %v3062_v44  ;;  %2366 = vpow2.f32 %v1174_v18  ;;  %v1300_v13 = vadd.f32 %v3062_v44, %v3060_v41  ;;  %v1166_v18 = vmul.f32 1.442695, %v1096_v31  ;;  %v1093_v31 = vsub.f32 %v2890_v54, %v3012_v55 }
 0x2a6   : > { %2368 = vpow2.f32 %v1176_v40  ;;  %v1168_v40 = vmul.f32 1.442695, %v1097_v11  ;;  %v446_v11 = vld [vmem:[%s4301_s5 + $0x8] sm:$0xff]  ;;  %v1090_v54 = vsub.f32 %v2880_v49, %v3004_v47  ;;  %v1054_v55 = vmax.f32 %v3026_v4, %v3028_v7 }
 0x2a7   : > { %2370 = vpow2.f32 %v1170_v9  ;;  %v1164_v9 = vmul.f32 1.442695, %v1095_v62  ;;  %v1051_v49 = vmax.f32 %v3016_v59, %v3018_v60 }
 0x2a8   : > { %v3064_v5 = vpop.f32.mrf.mxu2  ;;  %v3066_v48 = vpop.f32.mrf.mxu3  ;;  %2372 = vpow2.f32 %v1172_v1  ;;  %v1154_v62 = vmul.f32 1.442695, %v1090_v54 }
 0x2a9   : > { %v3068_v56 = vpop.eup %2362  ;;  %v1066_v12 = vmax.f32 %v3064_v5, %v3066_v48  ;;  %2374 = vpow2.f32 %v1166_v18  ;;  %v1160_v18 = vmul.f32 1.442695, %v1093_v31 }
 0x2aa   : > { %4364 = vst [vmem:[#allocation16_spill] sm:$0xff] %v3068_v56  ;;  %v3073_v63 = vpop.eup %2364  ;;  %2376 = vpow2.f32 %v1168_v40 }
 0x2ab   : > { %4365 = vst [vmem:[#allocation17_spill] sm:$0xff] %v3073_v63  ;;  %1067 = vmax.xlane.f32.xlu2 %v1066_v12  ;;  %v1306_v19 = vadd.f32 %v3073_v63, %v3068_v56  ;;  %v3080_v28 = vpop.eup %2366 }
 0x2ac   : > { %4366 = vst [vmem:[#allocation18_spill] sm:$0xff] %v3080_v28  ;;  %v3082_v10 = vpop.eup %2368 }
 0x2ad   : > { %1307 = vadd.xlane.f32.xlu1 %v1306_v19  ;;  %1301 = vadd.xlane.f32.xlu0 %v1300_v13  ;;  %4367 = vst [vmem:[#allocation19_spill] sm:$0xff] %v3082_v10  ;;  %v1297_v17 = vadd.f32 %v3082_v10, %v3080_v28  ;;  %v3092_v6 = vpop.eup %2370  ;;  %v1162_v19 = vmul.f32 1.442695, %v1094_v61  ;;  %v445_v13 = vld [vmem:[%s4301_s5] sm:$0xff]  ;;  %v1091_v61 = vsub.f32 %v2882_v50, %v3004_v47  ;;  %v447_v50 = vld [vmem:[%s4301_s5 + $0x10] sm:$0xff] }
 0x2ae   : > { %4368 = vst [vmem:[#allocation20_spill] sm:$0xff] %v3092_v6  ;;  %v3094_v12 = vpop.eup %2372  ;;  %2211 = vmatmul.msk.f32.vlgmr.msra.gmra.mxu0 %vm351_vm0, %v445_v13  ;;  %2219 = vmatmul.msk.f32.vlgmr.msra.gmra.mxu1 %vm351_vm0, %v445_v13 }
 0x2af   : > { %4369 = vst [vmem:[#allocation21_spill] sm:$0xff] %v3094_v12  ;;  %v1294_v3 = vadd.f32 %v3094_v12, %v3092_v6  ;;  %v3109_v57 = vpop.eup %2374  ;;  %2378 = vpow2.f32 %v1162_v19 }
 0x2b0   : > { %4370 = vst [vmem:[#allocation22_spill] sm:$0xff] %v3109_v57  ;;  %v3111_v1 = vpop.eup %2376  ;;  %2380 = vpow2.f32 %v1164_v9 }
 0x2b1   : > { %4371 = vst [vmem:[#allocation23_spill] sm:$0xff] %v3111_v1 }
 0x2b3   : > { %1064 = vmax.xlane.f32.xlu2 %v1063_v2  ;;  %v1291_v2 = vadd.f32 %v3111_v1, %v3109_v57 }
 0x2b5   : > { %1298 = vadd.xlane.f32.xlu0 %v1297_v17  ;;  %v1158_v17 = vmul.f32 1.442695, %v1092_v58  ;;  %v3126_v53 = vpop.eup %2378 }
 0x2b6   : > { %2212 = vmatmul.msk.f32.gmra.mxu0 %vm351_vm0, %v446_v11  ;;  %2220 = vmatmul.msk.f32.gmra.mxu1 %vm351_vm0, %v446_v11  ;;  %4372 = vst [vmem:[#allocation24_spill] sm:$0xff] %v3126_v53  ;;  %v3128_v40 = vpop.eup %2380  ;;  %v1023_v11 = vpop.xlane.xlu2 %1022 }
 0x2b7   : > { %4373 = vst [vmem:[#allocation25_spill] sm:$0xff] %v3128_v40  ;;  %2382 = vpow2.f32 %v1158_v17  ;;  %v1042_v17 = vmax.f32 %v2994_v42, %v2996_v43  ;;  %v1108_v1 = vsub.f32 %v2950_v20, %v1023_v11  ;;  %v1109_v57 = vsub.f32 %v2952_v21, %v1023_v11 }
 0x2b8   : > { %2384 = vpow2.f32 %v1160_v18  ;;  %v454_v18 = vld [vmem:[%s4302_s6 + $0x8] sm:$0xff] }
 0x2b9   : > { %2386 = vpow2.f32 %v1154_v62  ;;  %v453_v62 = vld [vmem:[%s4302_s6] sm:$0xff]  ;;  %v1190_v6 = vmul.f32 1.442695, %v1108_v1  ;;  %v1192_v10 = vmul.f32 1.442695, %v1109_v57 }
 0x2bb   : > { %1061 = vmax.xlane.f32.xlu2 %v1060_v8  ;;  %v1288_v8 = vadd.f32 %v3128_v40, %v3126_v53 }
 0x2bd   : > { %1295 = vadd.xlane.f32.xlu0 %v1294_v3  ;;  %v1156_v3 = vmul.f32 1.442695, %v1091_v61  ;;  %v3138_v19 = vpop.eup %2382  ;;  %v3168_v61 = vpop.f32.mrf.mxu3 }
 0x2be   : > { %4374 = vst [vmem:[#allocation26_spill] sm:$0xff] %v3138_v19  ;;  %v3140_v13 = vpop.eup %2384  ;;  %2213 = vmatmul.msk.f32.gmra.mxu0 %vm351_vm0, %v447_v50  ;;  %2221 = vmatmul.msk.f32.gmra.mxu1 %vm351_vm0, %v447_v50  ;;  %v1026_v54 = vpop.xlane.xlu2 %1025 }
 0x2bf   : > { %4375 = vst [vmem:[#allocation27_spill] sm:$0xff] %v3140_v13  ;;  %2388 = vpow2.f32 %v1156_v3  ;;  %v1285_v47 = vadd.f32 %v3140_v13, %v3138_v19  ;;  %v3151_v9 = vpop.eup %2386  ;;  %v1111_v41 = vsub.f32 %v2958_v24, %v1026_v54 }
 0x2c0   : > { %4376 = vst [vmem:[#allocation28_spill] sm:$0xff] %v3151_v9  ;;  %2390 = vpow2.f32 %v1190_v6  ;;  %v1110_v6 = vsub.f32 %v2956_v23, %v1026_v54 }
 0x2c1   : > { %2392 = vpow2.f32 %v1192_v10 }
 0x2c3   : > { %1058 = vmax.xlane.f32.xlu2 %v1057_v0  ;;  %v1048_v0 = vmax.f32 %v3008_v51, %v3010_v52 }
 0x2c5   : > { %1292 = vadd.xlane.f32.xlu0 %v1291_v2  ;;  %v3153_v58 = vpop.eup %2388  ;;  %v1045_v2 = vmax.f32 %v3000_v45, %v3002_v46 }
 0x2c6   : > { %4377 = vst [vmem:[#allocation29_spill] sm:$0xff] %v3153_v58  ;;  %v1282_v31 = vadd.f32 %v3153_v58, %v3151_v9  ;;  %v3226_v11 = vpop.eup %2390  ;;  %v3236_v22 = vpop.xlane.xlu0 %1034 }
 0x2c7   : > { %v3228_v57 = vpop.eup %2392 }
 0x2c8   : > { %v1309_v10 = vadd.f32 %v3228_v57, %v3226_v11 }
 0x2cb   : > { %1055 = vmax.xlane.f32.xlu2 %v1054_v55  ;;  %v3166_v55 = vpop.f32.mrf.mxu2 }
 0x2cc   : > { %v1069_v44 = vmax.f32 %v3166_v55, %v3168_v61 }
 0x2cd   : > { %1289 = vadd.xlane.f32.xlu0 %v1288_v8  ;;  %v3170_v8 = vpop.xlane.xlu2 %1028 }
 0x2ce   : > { %v1112_v63 = vsub.f32 %v2962_v26, %v3170_v8  ;;  %v1113_v23 = vsub.f32 %v2964_v27, %v3170_v8 }
 0x2d0   : > { %v1200_v26 = vmul.f32 1.442695, %v1113_v23 }
 0x2d3   : > { %1052 = vmax.xlane.f32.xlu2 %v1051_v49  ;;  %v3175_v3 = vpop.f32.mrf.mxu2  ;;  %v3177_v49 = vpop.f32.mrf.mxu3 }
 0x2d5   : > { %1286 = vadd.xlane.f32.xlu0 %v1285_v47  ;;  %v3179_v50 = vpop.xlane.xlu2 %1031  ;;  %v455_v47 = vld [vmem:[%s4302_s6 + $0x10] sm:$0xff] }
 0x2db   : > { %1049 = vmax.xlane.f32.xlu2 %v1048_v0 }
 0x2dd   : > { %1283 = vadd.xlane.f32.xlu0 %v1282_v31  ;;  %v3184_v0 = vpop.xlane.xlu2 %1037  ;;  %v3186_v31 = vpop.f32.mrf.mxu2 }
 0x2e3   : > { %1046 = vmax.xlane.f32.xlu2 %v1045_v2  ;;  %v3188_v2 = vpop.f32.mrf.mxu3 }
 0x2eb   : > { %1043 = vmax.xlane.f32.xlu2 %v1042_v17  ;;  %v3190_v17 = vpop.xlane.xlu2 %1040  ;;  %v3194_v58 = vpop.f32.mrf.mxu3 }
 0x2f1   : > { %468 = vperm.xlu0 %2350, %v454_v18   ;;  %v3192_v18 = vpop.f32.mrf.mxu2 }
 0x2f2   : > { %v1078_v13 = vmax.f32 %v3192_v18, %v3194_v58 }
 0x2f3   : > { %v3204_v19 = vpop.f32.mrf.mxu3 }
 0x2fb   : > { %v3214_v12 = vpop.f32.mrf.mxu3 }
 0x303   : > { %463 = vperm.xlu2 %2351, %v453_v62   ;;  %v1075_v62 = vmax.f32 %v3186_v31, %v3188_v2  ;;  %v3224_v21 = vpop.f32.mrf.mxu3 }
 0x30b   : > { %473 = vperm.xlu2 %2351, %v455_v47   ;;  %v3202_v47 = vpop.f32.mrf.mxu2 }
 0x30c   : > { %v1081_v53 = vmax.f32 %v3202_v47, %v3204_v19 }
 0x31b   : > { %1076 = vmax.xlane.f32.xlu0 %v1075_v62  ;;  %v3212_v62 = vpop.f32.mrf.mxu2 }
 0x31e   : > { %v3198_v9 = vpop.xlane.xlu2 %1067 }
 0x323   : > { %1079 = vmax.xlane.f32.xlu0 %v1078_v13  ;;  %v1084_v13 = vmax.f32 %v3212_v62, %v3214_v12  ;;  %v3222_v20 = vpop.f32.mrf.mxu2 }
 0x326   : > { %v3206_v40 = vpop.xlane.xlu2 %1064 }
 0x32b   : > { %1082 = vmax.xlane.f32.xlu0 %v1081_v53  ;;  %v1087_v53 = vmax.f32 %v3222_v20, %v3224_v21 }
 0x32e   : > { %v3216_v28 = vpop.xlane.xlu2 %1061 }
 0x333   : > { %1085 = vmax.xlane.f32.xlu0 %v1084_v13  ;;  %v1196_v13 = vmul.f32 1.442695, %v1111_v41 }
 0x334   : > { %1070 = vmax.xlane.f32.xlu2 %v1069_v44  ;;  %v1194_v44 = vmul.f32 1.442695, %v1110_v6  ;;  %v1072_v6 = vmax.f32 %v3175_v3, %v3177_v49 }
 0x336   : > { %v1059_v1 = vpop.xlane.xlu2 %1058  ;;  %2394 = vpow2.f32 %v1194_v44  ;;  %v1135_v44 = vsub.f32 %v3042_v37, %v3216_v28  ;;  %v448_v37 = vld [vmem:[%s4301_s5 + $0x18] sm:$0xff] }
 0x337   : > { %2396 = vpow2.f32 %v1196_v13  ;;  %v1132_v24 = vsub.f32 %v3032_v15, %v1059_v1  ;;  %v1133_v41 = vsub.f32 %v3034_v16, %v1059_v1  ;;  %v1115_v16 = vsub.f32 %v2970_v30, %v3179_v50  ;;  %2214 = vmatmul.msk.f32.gmra.mxu0 %vm351_vm0, %v448_v37  ;;  %2222 = vmatmul.msk.f32.gmra.mxu1 %vm351_vm0, %v448_v37 }
 0x339   : > { %v1240_v27 = vmul.f32 1.442695, %v1133_v41  ;;  %v1204_v30 = vmul.f32 1.442695, %v1115_v16  ;;  %v1116_v41 = vsub.f32 %v2974_v32, %v3236_v22 }
 0x33b   : > { %1088 = vmax.xlane.f32.xlu0 %v1087_v53 }
 0x33c   : > { %1310 = vadd.xlane.f32.xlu2 %v1309_v10  ;;  %v1198_v10 = vmul.f32 1.442695, %v1112_v63  ;;  %v1134_v63 = vsub.f32 %v3040_v34, %v3216_v28 }
 0x33e   : > { %v1056_v39 = vpop.xlane.xlu2 %1055 }
 0x33f   : > { %v1130_v56 = vsub.f32 %v3026_v4, %v1056_v39  ;;  %v1131_v46 = vsub.f32 %v3028_v7, %v1056_v39  ;;  %v1238_v39 = vmul.f32 1.442695, %v1132_v24  ;;  %v3248_v4 = vpop.eup %2394  ;;  %v3250_v7 = vpop.xlane.xlu0 %1304  ;;  %v1242_v24 = vmul.f32 1.442695, %v1134_v63 }
 0x340   : > { %v3254_v15 = vpop.eup %2396  ;;  %v1206_v63 = vmul.f32 1.442695, %v1116_v41 }
 0x341   : > { %v1234_v54 = vmul.f32 1.442695, %v1130_v56  ;;  %v1236_v53 = vmul.f32 1.442695, %v1131_v46  ;;  %v1114_v46 = vsub.f32 %v2968_v29, %v3179_v50  ;;  %v1312_v13 = vadd.f32 %v3254_v15, %v3248_v4 }
 0x343   : > { %2398 = vpow2.f32 %v1234_v54  ;;  %v1202_v29 = vmul.f32 1.442695, %v1114_v46  ;;  %v1244_v54 = vmul.f32 1.442695, %v1135_v44  ;;  %v1136_v46 = vsub.f32 %v3048_v14, %v3206_v40 }
 0x344   : > { %2400 = vpow2.f32 %v1236_v53  ;;  %1073 = vmax.xlane.f32.xlu2 %v1072_v6 }
 0x345   : > { %2402 = vpow2.f32 %v1198_v10  ;;  %v1246_v14 = vmul.f32 1.442695, %v1136_v46 }
 0x346   : > { %v3252_v8 = vpop.xlane.xlu2 %1052  ;;  %2404 = vpow2.f32 %v1200_v26 }
 0x347   : > { %2406 = vpow2.f32 %v1238_v39  ;;  %v1117_v39 = vsub.f32 %v2976_v33, %v3236_v22 }
 0x348   : > { %2408 = vpow2.f32 %v1240_v27  ;;  %v3291_v27 = vpop.xlane.xlu0 %1301 }
 0x349   : > { %v3260_v56 = vpop.eup %2398  ;;  %2410 = vpow2.f32 %v1202_v29  ;;  %v1208_v22 = vmul.f32 1.442695, %v1117_v39 }
 0x34a   : > { %4378 = vst [vmem:[#allocation30_spill] sm:$0xff] %v3260_v56  ;;  %v3264_v1 = vpop.eup %2400  ;;  %2412 = vpow2.f32 %v1204_v30 }
 0x34b   : > { %4379 = vst [vmem:[#allocation31_spill] sm:$0xff] %v3264_v1  ;;  %v1342_v23 = vadd.f32 %v3264_v1, %v3260_v56  ;;  %v3272_v50 = vpop.eup %2402  ;;  %2414 = vpow2.f32 %v1242_v24  ;;  %v1119_v24 = vsub.f32 %v2982_v36, %v3184_v0 }
 0x34c   : > { %1313 = vadd.xlane.f32.xlu2 %v1312_v13  ;;  %v3274_v34 = vpop.eup %2404  ;;  %2416 = vpow2.f32 %v1244_v54 }
 0x34d   : > { %1343 = vadd.xlane.f32.xlu0 %v1342_v23  ;;  %v3279_v28 = vpop.eup %2406  ;;  %v1315_v16 = vadd.f32 %v3274_v34, %v3272_v50  ;;  %v1118_v23 = vsub.f32 %v2980_v35, %v3184_v0  ;;  %v1212_v36 = vmul.f32 1.442695, %v1119_v24 }
 0x34e   : > { %v1050_v53 = vpop.xlane.xlu2 %1049  ;;  %4380 = vst [vmem:[#allocation32_spill] sm:$0xff] %v3279_v28  ;;  %v3287_v26 = vpop.eup %2408 }
 0x34f   : > { %v1126_v6 = vsub.f32 %v3008_v51, %v1050_v53  ;;  %v1127_v10 = vsub.f32 %v3010_v52, %v1050_v53  ;;  %4381 = vst [vmem:[#allocation33_spill] sm:$0xff] %v3287_v26  ;;  %v1137_v52 = vsub.f32 %v3050_v25, %v3206_v40  ;;  %v1345_v33 = vadd.f32 %v3287_v26, %v3279_v28  ;;  %v3301_v44 = vpop.eup %2410 }
 0x350   : > { %v3303_v13 = vpop.eup %2412  ;;  %v3317_v53 = vpop.xlane.xlu0 %1298 }
 0x351   : > { %v1226_v32 = vmul.f32 1.442695, %v1126_v6  ;;  %v1228_v51 = vmul.f32 1.442695, %v1127_v10  ;;  %v1248_v29 = vmul.f32 1.442695, %v1137_v52  ;;  %v3305_v25 = vpop.eup %2414  ;;  %v1318_v37 = vadd.f32 %v3303_v13, %v3301_v44 }
 0x352   : > { %4382 = vst [vmem:[#allocation34_spill] sm:$0xff] %v3305_v25  ;;  %v3307_v40 = vpop.eup %2416  ;;  %v1210_v6 = vmul.f32 1.442695, %v1118_v23 }
 0x353   : > { %2418 = vpow2.f32 %v1226_v32  ;;  %4383 = vst [vmem:[#allocation35_spill] sm:$0xff] %v3307_v40  ;;  %v1348_v35 = vadd.f32 %v3307_v40, %v3305_v25  ;;  %v1120_v32 = vsub.f32 %v2986_v38, %v3190_v17 }
 0x354   : > { %2420 = vpow2.f32 %v1228_v51  ;;  %1316 = vadd.xlane.f32.xlu2 %v1315_v16  ;;  %v4388_v51 = vld [vmem:[#allocation10_spill] sm:$0xff] }
 0x355   : > { %1346 = vadd.xlane.f32.xlu0 %v1345_v33  ;;  %2422 = vpow2.f32 %v1206_v63  ;;  %v1121_v52 = vsub.f32 %v4388_v51, %v3190_v17  ;;  %v1214_v33 = vmul.f32 1.442695, %v1120_v32  ;;  %v456_v32 = vld [vmem:[%s4302_s6 + $0x18] sm:$0xff] }
 0x356   : > { %2424 = vpow2.f32 %v1208_v22 }
 0x357   : > { %2426 = vpow2.f32 %v1246_v14  ;;  %v1216_v14 = vmul.f32 1.442695, %v1121_v52 }
 0x358   : > { %2428 = vpow2.f32 %v1248_v29  ;;  %v3341_v22 = vpop.xlane.xlu0 %1295 }
 0x359   : > { %v3311_v30 = vpop.eup %2418  ;;  %2430 = vpow2.f32 %v1210_v6  ;;  %v3359_v6 = vpop.xlane.xlu2 %1046 }
 0x35a   : > { %4384 = vst [vmem:[#allocation36_spill] sm:$0xff] %v3311_v30  ;;  %v3315_v54 = vpop.eup %2420  ;;  %2432 = vpow2.f32 %v1212_v36 }
 0x35b   : > { %4385 = vst [vmem:[#allocation37_spill] sm:$0xff] %v3315_v54  ;;  %v1336_v41 = vadd.f32 %v3315_v54, %v3311_v30  ;;  %v3325_v10 = vpop.eup %2422  ;;  %2434 = vpow2.f32 %v1214_v33  ;;  %v450_v30 = vld [vmem:[%s4301_s5 + $0x28] sm:$0xff] }
 0x35c   : > { %1319 = vadd.xlane.f32.xlu2 %v1318_v37  ;;  %v3327_v0 = vpop.eup %2424  ;;  %2436 = vpow2.f32 %v1216_v14  ;;  %v449_v14 = vld [vmem:[%s4301_s5 + $0x20] sm:$0xff] }
 0x35d   : > { %1337 = vadd.xlane.f32.xlu1 %v1336_v41  ;;  %1349 = vadd.xlane.f32.xlu0 %v1348_v35  ;;  %v3329_v39 = vpop.eup %2426  ;;  %v1321_v16 = vadd.f32 %v3327_v0, %v3325_v10 }
 0x35e   : > { %4386 = vst [vmem:[#allocation38_spill] sm:$0xff] %v3329_v39  ;;  %v3331_v46 = vpop.eup %2428  ;;  %2215 = vmatmul.msk.f32.gmra.mxu0 %vm351_vm0, %v449_v14  ;;  %2223 = vmatmul.msk.f32.gmra.mxu1 %vm351_vm0, %v449_v14 }
 0x35f   : > { %4387 = vst [vmem:[#allocation39_spill] sm:$0xff] %v3331_v46  ;;  %v1351_v63 = vadd.f32 %v3331_v46, %v3329_v39  ;;  %v3343_v29 = vpop.eup %2430  ;;  %v460_v46 = vld [vmem:[%s4302_s6 + $0x38] sm:$0xff] }
 0x360   : > { %v3345_v23 = vpop.eup %2432  ;;  %v3351_v24 = vpop.xlane.xlu0 %1292 }
 0x361   : > { %v1324_v38 = vadd.f32 %v3345_v23, %v3343_v29  ;;  %v3349_v17 = vpop.eup %2434  ;;  %v3366_v51 = vpop.xlane.xlu2 %1043 }
 0x362   : > { %v3353_v37 = vpop.eup %2436 }
 0x363   : > { %v1327_v41 = vadd.f32 %v3353_v37, %v3349_v17 }
 0x364   : > { %1322 = vadd.xlane.f32.xlu2 %v1321_v16 }
 0x365   : > { %1352 = vadd.xlane.f32.xlu0 %v1351_v63 }
 0x366   : > { %2216 = vmatmul.msk.f32.gmra.mxu0 %vm351_vm0, %v450_v30  ;;  %2224 = vmatmul.msk.f32.gmra.mxu1 %vm351_vm0, %v450_v30 }
 0x368   : > { %v3357_v35 = vpop.xlane.xlu0 %1289 }
 0x369   : > { %v3372_v63 = vpop.permute.xlu2 %463 }
 0x36c   : > { %1325 = vadd.xlane.f32.xlu2 %v1324_v38 }
 0x370   : > { %v3361_v36 = vpop.xlane.xlu0 %1286 }
 0x371   : > { %v3381_v38 = vpop.permute.xlu2 %473 }
 0x374   : > { %1328 = vadd.xlane.f32.xlu2 %v1327_v41  ;;  %v1138_v41 = vsub.f32 %v3064_v5, %v3198_v9 }
 0x376   : > { %v1250_v54 = vmul.f32 1.442695, %v1138_v41 }
 0x378   : > { %v3368_v52 = vpop.xlane.xlu0 %1283  ;;  %2438 = vpow2.f32 %v1250_v54 }
 0x380   : > { %v3370_v16 = vpop.permute.xlu0 %468 }
 0x38c   : > { %478 = vperm.xlu2 %2351, %v456_v32   ;;  %v1139_v32 = vsub.f32 %v3066_v48, %v3198_v9 }
 0x38e   : > { %v3374_v33 = vpop.xlane.xlu0 %1076  ;;  %v1252_v1 = vmul.f32 1.442695, %v1139_v32  ;;  %v451_v32 = vld [vmem:[%s4301_s5 + $0x30] sm:$0xff] }
 0x38f   : > { %2217 = vmatmul.msk.f32.gmra.mxu0 %vm351_vm0, %v451_v32  ;;  %2225 = vmatmul.msk.f32.gmra.mxu1 %vm351_vm0, %v451_v32  ;;  %v1144_v32 = vsub.f32 %v3186_v31, %v3374_v33 }
 0x390   : > { %2440 = vpow2.f32 %v1252_v1 }
 0x396   : > { %v1080_v56 = vpop.xlane.xlu0 %1079 }
 0x397   : > { %v1146_v5 = vsub.f32 %v3192_v18, %v1080_v56  ;;  %v1147_v48 = vsub.f32 %v3194_v58, %v1080_v56  ;;  %v1128_v58 = vsub.f32 %v3016_v59, %v3252_v8  ;;  %v1129_v56 = vsub.f32 %v3018_v60, %v3252_v8 }
 0x398   : > { %v1122_v60 = vsub.f32 %v2994_v42, %v3366_v51 }
 0x399   : > { %v1266_v40 = vmul.f32 1.442695, %v1146_v5  ;;  %v1268_v30 = vmul.f32 1.442695, %v1147_v48  ;;  %v1230_v54 = vmul.f32 1.442695, %v1128_v58 }
 0x39a   : > { %v1232_v5 = vmul.f32 1.442695, %v1129_v56  ;;  %v1145_v56 = vsub.f32 %v3188_v2, %v3374_v33 }
 0x3a7   : > { %v1071_v14 = vpop.xlane.xlu2 %1070 }
 0x3a8   : > { %v1140_v26 = vsub.f32 %v3166_v55, %v1071_v14  ;;  %v1141_v28 = vsub.f32 %v3168_v61, %v1071_v14  ;;  %v3401_v55 = vpop.eup %2438 }
 0x3a9   : > { %4389 = vst [vmem:[#allocation10_spill] sm:$0xff] %v3401_v55  ;;  %v3405_v18 = vpop.eup %2440 }
 0x3aa   : > { %v1254_v9 = vmul.f32 1.442695, %v1140_v26  ;;  %v1256_v41 = vmul.f32 1.442695, %v1141_v28  ;;  %4390 = vst [vmem:[#allocation40_spill] sm:$0xff] %v3405_v18  ;;  %v1354_v28 = vadd.f32 %v3405_v18, %v3401_v55 }
 0x3ac   : > { %2442 = vpow2.f32 %v1254_v9 }
 0x3ad   : > { %2444 = vpow2.f32 %v1256_v41  ;;  %v1123_v41 = vsub.f32 %v2996_v43, %v3366_v51  ;;  %v1264_v51 = vmul.f32 1.442695, %v1145_v56 }
 0x3ae   : > { %2446 = vpow2.f32 %v1266_v40 }
 0x3af   : > { %v3403_v61 = vpop.xlane.xlu2 %1310  ;;  %2448 = vpow2.f32 %v1268_v30 }
 0x3b0   : > { %2450 = vpow2.f32 %v1230_v54  ;;  %v1262_v54 = vmul.f32 1.442695, %v1144_v32 }
 0x3b1   : > { %2452 = vpow2.f32 %v1232_v5 }
 0x3b2   : > { %v3411_v1 = vpop.eup %2442 }
 0x3b3   : > { %4391 = vst [vmem:[#allocation41_spill] sm:$0xff] %v3411_v1  ;;  %v3415_v26 = vpop.eup %2444 }
 0x3b4   : > { %4392 = vst [vmem:[#allocation42_spill] sm:$0xff] %v3415_v26  ;;  %v1357_v14 = vadd.f32 %v3415_v26, %v3411_v1  ;;  %v3419_v48 = vpop.eup %2446 }
 0x3b5   : > { %1355 = vadd.xlane.f32.xlu2 %v1354_v28  ;;  %4393 = vst [vmem:[#allocation43_spill] sm:$0xff] %v3419_v48  ;;  %v3421_v40 = vpop.eup %2448  ;;  %v1083_v28 = vpop.xlane.xlu0 %1082 }
 0x3b6   : > { %1358 = vadd.xlane.f32.xlu0 %v1357_v14  ;;  %4394 = vst [vmem:[#allocation44_spill] sm:$0xff] %v3421_v40  ;;  %v1366_v42 = vadd.f32 %v3421_v40, %v3419_v48  ;;  %v3435_v43 = vpop.eup %2450  ;;  %v1148_v33 = vsub.f32 %v3202_v47, %v1083_v28 }
 0x3b7   : > { %v1074_v59 = vpop.xlane.xlu2 %1073  ;;  %4395 = vst [vmem:[#allocation45_spill] sm:$0xff] %v3435_v43  ;;  %v3439_v31 = vpop.eup %2452 }
 0x3b8   : > { %v1142_v8 = vsub.f32 %v3175_v3, %v1074_v59  ;;  %v1143_v9 = vsub.f32 %v3177_v49, %v1074_v59  ;;  %v1218_v3 = vmul.f32 1.442695, %v1122_v60  ;;  %v1220_v49 = vmul.f32 1.442695, %v1123_v41  ;;  %4396 = vst [vmem:[#allocation46_spill] sm:$0xff] %v3439_v31 }
 0x3b9   : > { %v1149_v59 = vsub.f32 %v3204_v19, %v1083_v28  ;;  %v1339_v60 = vadd.f32 %v3439_v31, %v3435_v43  ;;  %v1270_v32 = vmul.f32 1.442695, %v1148_v33 }
 0x3ba   : > { %v1258_v30 = vmul.f32 1.442695, %v1142_v8  ;;  %v1260_v58 = vmul.f32 1.442695, %v1143_v9 }
 0x3bb   : > { %v1272_v47 = vmul.f32 1.442695, %v1149_v59 }
 0x3bc   : > { %2454 = vpow2.f32 %v1258_v30 }
 0x3bd   : > { %2456 = vpow2.f32 %v1260_v58  ;;  %1367 = vadd.xlane.f32.xlu2 %v1366_v42  ;;  %v1086_v9 = vpop.xlane.xlu0 %1085 }
 0x3be   : > { %2458 = vpow2.f32 %v1218_v3  ;;  %v1150_v28 = vsub.f32 %v3212_v62, %v1086_v9  ;;  %v1151_v42 = vsub.f32 %v3214_v12, %v1086_v9 }
 0x3bf   : > { %v3437_v14 = vpop.xlane.xlu2 %1313  ;;  %2460 = vpow2.f32 %v1220_v49 }
 0x3c0   : > { %2462 = vpow2.f32 %v1262_v54  ;;  %v1274_v54 = vmul.f32 1.442695, %v1150_v28 }
 0x3c1   : > { %2464 = vpow2.f32 %v1264_v51  ;;  %v1276_v51 = vmul.f32 1.442695, %v1151_v42 }
 0x3c2   : > { %v3441_v2 = vpop.eup %2454  ;;  %2466 = vpow2.f32 %v1270_v32 }
 0x3c3   : > { %4397 = vst [vmem:[#allocation47_spill] sm:$0xff] %v3441_v2  ;;  %v3444_v5 = vpop.eup %2456  ;;  %2468 = vpow2.f32 %v1272_v47 }
 0x3c4   : > { %4398 = vst [vmem:[#allocation48_spill] sm:$0xff] %v3444_v5  ;;  %v1360_v8 = vadd.f32 %v3444_v5, %v3441_v2  ;;  %v3451_v41 = vpop.eup %2458  ;;  %2470 = vpow2.f32 %v1274_v54 }
 0x3c5   : > { %1340 = vadd.xlane.f32.xlu2 %v1339_v60  ;;  %4399 = vst [vmem:[#allocation49_spill] sm:$0xff] %v3451_v41  ;;  %v3453_v30 = vpop.eup %2460  ;;  %v1089_v33 = vpop.xlane.xlu0 %1088  ;;  %2472 = vpow2.f32 %v1276_v51 }
 0x3c6   : > { %1361 = vadd.xlane.f32.xlu0 %v1360_v8  ;;  %4400 = vst [vmem:[#allocation50_spill] sm:$0xff] %v3453_v30  ;;  %v3457_v56 = vpop.eup %2462  ;;  %v1330_v3 = vadd.f32 %v3453_v30, %v3451_v41  ;;  %v1152_v12 = vsub.f32 %v3222_v20, %v1089_v33  ;;  %v1153_v62 = vsub.f32 %v3224_v21, %v1089_v33  ;;  %v458_v21 = vld [vmem:[%s4302_s6 + $0x28] sm:$0xff]  ;;  %v459_v33 = vld [vmem:[%s4302_s6 + $0x30] sm:$0xff] }
 0x3c7   : > { %v3455_v58 = vpop.xlane.xlu2 %1316  ;;  %4401 = vst [vmem:[#allocation51_spill] sm:$0xff] %v3457_v56  ;;  %v3459_v19 = vpop.eup %2464  ;;  %488 = vperm.xlu1 %2352, %v458_v21  }
 0x3c8   : > { %4402 = vst [vmem:[#allocation52_spill] sm:$0xff] %v3459_v19  ;;  %v1363_v49 = vadd.f32 %v3459_v19, %v3457_v56  ;;  %v3469_v60 = vpop.eup %2466  ;;  %v1278_v32 = vmul.f32 1.442695, %v1152_v12  ;;  %v1280_v47 = vmul.f32 1.442695, %v1153_v62  ;;  %v452_v12 = vld [vmem:[%s4301_s5 + $0x38] sm:$0xff] }
 0x3c9   : > { %4403 = vst [vmem:[#allocation53_spill] sm:$0xff] %v3469_v60  ;;  %v3471_v8 = vpop.eup %2468  ;;  %2218 = vmatmul.msk.f32.gmra.mxu0 %vm351_vm0, %v452_v12  ;;  %2226 = vmatmul.msk.f32.gmra.mxu1 %vm351_vm0, %v452_v12 }
 0x3ca   : > { %4404 = vst [vmem:[#allocation54_spill] sm:$0xff] %v3471_v8  ;;  %v1369_v9 = vadd.f32 %v3471_v8, %v3469_v60  ;;  %v3479_v42 = vpop.eup %2470  ;;  %2474 = vpow2.f32 %v1278_v32 }
 0x3cb   : > { %2476 = vpow2.f32 %v1280_v47 }
 0x3cd   : > { %1331 = vadd.xlane.f32.xlu2 %v1330_v3  ;;  %v3481_v3 = vpop.eup %2472 }
 0x3ce   : > { %1364 = vadd.xlane.f32.xlu0 %v1363_v49  ;;  %4405 = vst [vmem:[#allocation55_spill] sm:$0xff] %v3481_v3  ;;  %v1372_v20 = vadd.f32 %v3481_v3, %v3479_v42 }
 0x3cf   : > { %v3467_v59 = vpop.xlane.xlu2 %1319  ;;  %498 = vperm.xlu1 %2352, %v460_v46  }
 0x3d0   : > { %v3490_v54 = vpop.eup %2474  ;;  %vm1575_vm14 = vweird.f32 %v3467_v59 }
 0x3d1   : > { %v3493_v51 = vpop.eup %2476 }
 0x3d2   : > { %v1375_v62 = vadd.f32 %v3493_v51, %v3490_v54 }
 0x3d6   : > { %1370 = vadd.xlane.f32.xlu0 %v1369_v9 }
 0x3d7   : > { %v3477_v28 = vpop.xlane.xlu2 %1322 }
 0x3d8   : > { %vm1591_vm10 = vweird.f32 %v3477_v28  ;;  %v1595_v3 = vand.u32 2147483647, %v3477_v28 }
 0x3da   : > { %vm1596_vm15 = vcmp.eq.f32.partialorder %v1595_v3, 8.507059e+37 }
 0x3de   : > { %1373 = vadd.xlane.f32.xlu0 %v1372_v20 }
 0x3df   : > { %v3485_v49 = vpop.xlane.xlu2 %1325 }
 0x3e0   : > { %2478 = vrcp.f32 %v3485_v49  ;;  %vm1607_vm4 = vweird.f32 %v3485_v49  ;;  %v1613_v2 = vand.u32 2147483648, %v3485_v49 }
 0x3e1   : > { %2480 = vrcp.f32 %v3477_v28 }
 0x3e2   : > { %2482 = vrcp.f32 %v3467_v59 }
 0x3e3   : > { %2484 = vrcp.f32 %v3455_v58 }
 0x3e5   : > { %493 = vperm.xlu2 %2351, %v459_v33  }
 0x3e6   : > { %v3507_v9 = vpop.eup %2478  ;;  %1376 = vadd.xlane.f32.xlu0 %v1375_v62 }
 0x3e7   : > { %v3509_v32 = vpop.eup %2480  ;;  %v1603_v47 = vmul.f32 %v3507_v9, %v3485_v49  ;;  %v1329_v20 = vpop.xlane.xlu2 %1328  ;;  %vm1608_vm2 = vweird.f32 %v3507_v9 }
 0x3e8   : > { %2486 = vrcp.f32 %v1329_v20  ;;  %v1587_v21 = vmul.f32 %v3509_v32, %v3477_v28  ;;  %v3516_v30 = vpop.eup %2482  ;;  %v1629_v26 = vand.u32 2147483648, %v1329_v20  ;;  %v1627_v5 = vand.u32 2147483647, %v1329_v20  ;;  %vm3543_vm6 = vmor %vm1607_vm4, %vm1608_vm2 }
 0x3e9   : > { %v1604_v12 = vsub.f32 1.0, %v1603_v47  ;;  %2488 = vrcp.f32 %v3437_v14  ;;  %v3519_v33 = vpop.eup %2484  ;;  %v1571_v41 = vmul.f32 %v3516_v30, %v3467_v59  ;;  %v3528_v47 = vpop.xlane.xlu1 %1307  ;;  %vm1623_vm5 = vweird.f32 %v1329_v20 }
 0x3ea   : > { %v1588_v31 = vsub.f32 1.0, %v1587_v21  ;;  %2490 = vrcp.f32 %v3250_v7  ;;  %v1555_v39 = vmul.f32 %v3519_v33, %v3455_v58  ;;  %v1630_v40 = vor.u32 1.1754944e-38, %v1629_v26 }
 0x3eb   : > { %v1605_v43 = vmul.f32 %v3507_v9, %v1604_v12  ;;  %2492 = vrcp.f32 %v3403_v61  ;;  %v1572_v21 = vsub.f32 1.0, %v1571_v41  ;;  %vm1592_vm8 = vweird.f32 %v3509_v32 }
 0x3ec   : > { %v1589_v12 = vmul.f32 %v3509_v32, %v1588_v31  ;;  %2494 = vrcp.f32 %v3528_v47  ;;  %vm1628_vm9 = vcmp.eq.f32.partialorder %v1627_v5, 8.507059e+37  ;;  %v1597_v26 = vand.u32 2147483648, %v3477_v28  ;;  %vm3572_vm12 = vmor %vm1591_vm10, %vm1592_vm8 }
 0x3ed   : > { %v1606_v46 = vadd.f32 %v3507_v9, %v1605_v43  ;;  %v1556_v43 = vsub.f32 1.0, %v1555_v39  ;;  %v1573_v56 = vmul.f32 %v3516_v30, %v1572_v21  ;;  %v1614_v21 = vor.u32 1.1754944e-38, %v1613_v2  ;;  %v2353_v2 = vld [vmem:[#allocation2] ss:$0 sm:$0xff] }
 0x3ee   : > { %v2487_v62 = vpop.eup %2486  ;;  %v1590_v39 = vadd.f32 %v3509_v32, %v1589_v12  ;;  %vm1576_vm13 = vweird.f32 %v3516_v30  ;;  %2496 = vrcp.f32 %v3291_v27  ;;  %v1598_v28 = vor.u32 1.1754944e-38, %v1597_v26  ;;  %2058 = vperm.xlu1 %2352, %v2353_v2  }
 0x3ef   : > { %v1619_v25 = vmul.f32 %v2487_v62, %v1329_v20  ;;  %v3533_v55 = vpop.eup %2488  ;;  %vm1624_vm3 = vweird.f32 %v2487_v62  ;;  %vm3592_vm0 = vmor %vm1575_vm14, %vm1576_vm13  ;;  %vm1560_vm1 = vweird.f32 %v3519_v33  ;;  %2498 = vrcp.f32 %v3317_v53 }
 0x3f0   : > { %v3548_v19 = vpop.eup %2490  ;;  %vm1625_vm7 = vmor %vm1623_vm5, %vm1624_vm3  ;;  %vm1559_vm2 = vweird.f32 %v3455_v58  ;;  %vm1544_vm5 = vweird.f32 %v3533_v55  ;;  %2500 = vrcp.f32 %v3341_v22  ;;  %vm1527_vm10 = vweird.f32 %v3403_v61 }
 0x3f1   : > { %v1620_v18 = vsub.f32 1.0, %v1619_v25  ;;  %v1539_v25 = vmul.f32 %v3533_v55, %v3437_v14  ;;  %v3552_v48 = vpop.eup %2492  ;;  %vm3610_vm4 = vmor %vm1559_vm2, %vm1560_vm1  ;;  %2502 = vrcp.f32 %v3351_v24  ;;  %vm1496_vm13 = vweird.f32 %v3548_v19 }
 0x3f2   : > { %vm1495_vm1 = vweird.f32 %v3250_v7  ;;  %2504 = vrcp.f32 %v3357_v35  ;;  %v1451_v2 = vand.u32 2147483647, %v3341_v22 }
 0x3f3   : > { %v1621_v1 = vmul.f32 %v2487_v62, %v1620_v18  ;;  %v1611_v18 = vand.u32 2147483647, %v3485_v49  ;;  %v1610_v49 = vsel %vm3543_vm6, %v3507_v9, %v1606_v46  ;;  %v1523_v9 = vmul.f32 %v3552_v48, %v3403_v61 }
 0x3f4   : > { %v1540_v46 = vsub.f32 1.0, %v1539_v25  ;;  %vm1543_vm6 = vweird.f32 %v3437_v14  ;;  %2506 = vrcp.f32 %v3361_v36 }
 0x3f5   : > { %v1622_v41 = vadd.f32 %v2487_v62, %v1621_v1  ;;  %v457_v1 = vld [vmem:[%s4302_s6 + $0x20] sm:$0xff]  ;;  %vm1612_vm11 = vcmp.eq.f32.partialorder %v1611_v18, 8.507059e+37  ;;  %v1524_v31 = vsub.f32 1.0, %v1523_v9  ;;  %vm3631_vm8 = vmor %vm1543_vm6, %vm1544_vm5  ;;  %vm1479_vm6 = vweird.f32 %v3291_v27 }
 0x3f6   : > { %v1615_v12 = vsel %vm1612_vm11, %v1614_v21, %v1610_v49  ;;  %2508 = vrcp.f32 %v3368_v52 }
 0x3f7   : > { %v1626_v20 = vsel %vm1625_vm7, %v2487_v62, %v1622_v41  ;;  %v3566_v62 = vpop.eup %2494  ;;  %v1616_v25 = vmul.f32 %v3343_v29, %v1615_v12  ;;  %v1579_v41 = vand.u32 2147483647, %v3467_v59 }
 0x3f8   : > { %v1631_v8 = vsel %vm1628_vm9, %v1630_v40, %v1626_v20  ;;  %v1574_v40 = vadd.f32 %v3516_v30, %v1573_v56  ;;  %v1507_v56 = vmul.f32 %v3566_v62, %v3528_v47  ;;  %v3608_v26 = vpop.eup %2496  ;;  %vm1528_vm9 = vweird.f32 %v3552_v48 }
 0x3f9   : > { %v1632_v60 = vmul.f32 %v3349_v17, %v1631_v8  ;;  %v1633_v5 = vmul.f32 %v3353_v37, %v1631_v8  ;;  %v1557_v17 = vmul.f32 %v3519_v33, %v1556_v43  ;;  %v1594_v37 = vsel %vm3572_vm12, %v3509_v32, %v1590_v39  ;;  %vm3650_vm12 = vmor %vm1527_vm10, %vm1528_vm9 }
 0x3fa   : > { %483 = vperm.xlu0 %2350, %v457_v1   ;;  %v1581_v8 = vand.u32 2147483648, %v3467_v59  ;;  %v1491_v32 = vmul.f32 %v3548_v19, %v3250_v7  ;;  %v1599_v18 = vsel %vm1596_vm15, %v1598_v28, %v1594_v37  ;;  %v1541_v1 = vmul.f32 %v3533_v55, %v1540_v46 }
 0x3fb   : > { %1890 = vmatpush.xpose.msrb.mxu0 %v1632_v60  ;;  %1931 = vmatpush.xpose.msrb.mxu1 %v1633_v5  ;;  %v1617_v60 = vmul.f32 %v3345_v23, %v1615_v12  ;;  %v1578_v29 = vsel %vm3592_vm0, %v3516_v30, %v1574_v40  ;;  %v1558_v23 = vadd.f32 %v3519_v33, %v1557_v17  ;;  %v1565_v59 = vand.u32 2147483648, %v3455_v58 }
 0x3fc   : > { %v1582_v3 = vor.u32 1.1754944e-38, %v1581_v8  ;;  %v1600_v20 = vmul.f32 %v3325_v10, %v1599_v18  ;;  %v1601_v49 = vmul.f32 %v3327_v0, %v1599_v18  ;;  %vm1580_vm3 = vcmp.eq.f32.partialorder %v1579_v41, 8.507059e+37  ;;  %v3625_v8 = vpop.eup %2498 }
 0x3fd   : > { %v1563_v39 = vand.u32 2147483647, %v3455_v58  ;;  %v1492_v30 = vsub.f32 1.0, %v1491_v32  ;;  %v1508_v21 = vsub.f32 1.0, %v1507_v56  ;;  %v1525_v46 = vmul.f32 %v3552_v48, %v1524_v31 }
 0x3fe   : > { %v1583_v5 = vsel %vm1580_vm3, %v1582_v3, %v1578_v29  ;;  %v1562_v10 = vsel %vm3610_vm4, %v3519_v33, %v1558_v23  ;;  %v1542_v0 = vadd.f32 %v3533_v55, %v1541_v1  ;;  %v1549_v58 = vand.u32 2147483648, %v3437_v14  ;;  %vm3693_vm4 = vmor %vm1495_vm1, %vm1496_vm13 }
 0x3ff   : > { %1891 = vmatpush.xpose.msrb.mxu0 %v1616_v25  ;;  %1932 = vmatpush.xpose.msrb.mxu1 %v1617_v60  ;;  %v1566_v12 = vor.u32 1.1754944e-38, %v1565_v59  ;;  %v1584_v17 = vmul.f32 %v3301_v44, %v1583_v5  ;;  %v1585_v37 = vmul.f32 %v3303_v13, %v1583_v5  ;;  %vm1564_vm7 = vcmp.eq.f32.partialorder %v1563_v39, 8.507059e+37  ;;  %v3655_v59 = vpop.xlane.xlu0 %1343 }
 0x400   : > { %v1547_v40 = vand.u32 2147483647, %v3437_v14  ;;  %v1493_v33 = vmul.f32 %v3548_v19, %v1492_v30  ;;  %v1475_v28 = vmul.f32 %v3608_v26, %v3291_v27  ;;  %v1509_v44 = vmul.f32 %v3566_v62, %v1508_v21 }
 0x401   : > { %v1567_v25 = vsel %vm1564_vm7, %v1566_v12, %v1562_v10  ;;  %v1546_v13 = vsel %vm3631_vm8, %v3533_v55, %v1542_v0  ;;  %v1526_v14 = vadd.f32 %v3552_v48, %v1525_v46  ;;  %v1533_v41 = vand.u32 2147483648, %v3403_v61 }
 0x402   : > { %v1550_v32 = vor.u32 1.1754944e-38, %v1549_v58  ;;  %v1568_v56 = vmul.f32 %v3272_v50, %v1567_v25  ;;  %v1569_v31 = vmul.f32 %v3274_v34, %v1567_v25  ;;  %vm1548_vm11 = vcmp.eq.f32.partialorder %v1547_v40, 8.507059e+37 }
 0x403   : > { %1892 = vmatpush.xpose.msrb.mxu0 %v1600_v20  ;;  %1933 = vmatpush.xpose.msrb.mxu1 %v1601_v49  ;;  %v1531_v18 = vand.u32 2147483647, %v3403_v61  ;;  %v1501_v55 = vand.u32 2147483648, %v3250_v7  ;;  %v1459_v43 = vmul.f32 %v3625_v8, %v3317_v53  ;;  %v1476_v23 = vsub.f32 1.0, %v1475_v28  ;;  %v3662_v61 = vpop.eup %2500 }
 0x404   : > { %v1551_v1 = vsel %vm1548_vm11, %v1550_v32, %v1546_v13  ;;  %v1530_v50 = vsel %vm3650_vm12, %v3552_v48, %v1526_v14  ;;  %v1510_v34 = vadd.f32 %v3566_v62, %v1509_v44  ;;  %vm1512_vm14 = vweird.f32 %v3566_v62  ;;  %v3670_v21 = vpop.eup %2502  ;;  %v4423_v14 = vld [vmem:[#allocation16_spill] sm:$0xff]  ;;  %v4424_v32 = vld [vmem:[#allocation17_spill] sm:$0xff] }
 0x405   : > { %vm1511_vm15 = vweird.f32 %v3528_v47  ;;  %v1517_v3 = vand.u32 2147483648, %v3528_v47  ;;  %v1534_v20 = vor.u32 1.1754944e-38, %v1533_v41  ;;  %v1515_v49 = vand.u32 2147483647, %v3528_v47 }
 0x406   : > { %v1552_v39 = vmul.f32 %v3248_v4, %v1551_v1  ;;  %v1553_v30 = vmul.f32 %v3254_v15, %v1551_v1  ;;  %vm1532_vm0 = vcmp.eq.f32.partialorder %v1531_v18, 8.507059e+37  ;;  %v1494_v48 = vadd.f32 %v3548_v19, %v1493_v33  ;;  %vm3676_vm2 = vmor %vm1511_vm15, %vm1512_vm14 }
 0x407   : > { %1893 = vmatpush.xpose.msrb.mxu0 %v1584_v17  ;;  %1934 = vmatpush.xpose.msrb.mxu1 %v1585_v37  ;;  %v1460_v5 = vsub.f32 1.0, %v1459_v43  ;;  %v1535_v9 = vsel %vm1532_vm0, %v1534_v20, %v1530_v50  ;;  %v1477_v4 = vmul.f32 %v3608_v26, %v1476_v23  ;;  %v1443_v15 = vmul.f32 %v3662_v61, %v3341_v22  ;;  %v4422_v17 = vld [vmem:[#allocation11_spill] sm:$0xff]  ;;  %v3715_v13 = vpop.xlane.xlu0 %1346  ;;  %v4427_v20 = vld [vmem:[#allocation12_spill] sm:$0xff] }
 0x408   : > { %v1514_v47 = vsel %vm3676_vm2, %v3566_v62, %v1510_v34  ;;  %v1499_v10 = vand.u32 2147483647, %v3250_v7  ;;  %v1502_v0 = vor.u32 1.1754944e-38, %v1501_v55  ;;  %v1518_v58 = vor.u32 1.1754944e-38, %v1517_v3 }
 0x409   : > { %v1124_v12 = vsub.f32 %v3000_v45, %v3359_v6  ;;  %vm1516_vm3 = vcmp.eq.f32.partialorder %v1515_v49, 8.507059e+37  ;;  %v1125_v37 = vsub.f32 %v4422_v17, %v3359_v6  ;;  %v1536_v62 = vmul.f32 %v3226_v11, %v1535_v9 }
 0x40a   : > { %v1537_v40 = vmul.f32 %v3228_v57, %v1535_v9  ;;  %v1498_v45 = vsel %vm3693_vm4, %v3548_v19, %v1494_v48  ;;  %v1461_v33 = vmul.f32 %v3625_v8, %v1460_v5  ;;  %v1427_v7 = vmul.f32 %v3670_v21, %v3351_v24  ;;  %v3711_v57 = vpop.eup %2504 }
 0x40b   : > { %1894 = vmatpush.xpose.msrb.mxu0 %v1568_v56  ;;  %1935 = vmatpush.xpose.msrb.mxu1 %v1569_v31  ;;  %v1519_v28 = vsel %vm1516_vm3, %v1518_v58, %v1514_v47  ;;  %v1485_v25 = vand.u32 2147483648, %v3291_v27  ;;  %v1444_v60 = vsub.f32 1.0, %v1443_v15  ;;  %v1478_v11 = vadd.f32 %v3608_v26, %v1477_v4  ;;  %v3732_v50 = vpop.eup %2506  ;;  %v4432_v58 = vld [vmem:[#allocation15_spill] sm:$0xff] }
 0x40c   : > { %vm1480_vm5 = vweird.f32 %v3608_v26  ;;  %v1222_v6 = vmul.f32 1.442695, %v1124_v12  ;;  %vm1500_vm7 = vcmp.eq.f32.partialorder %v1499_v10, 8.507059e+37  ;;  %v1483_v19 = vand.u32 2147483647, %v3291_v27  ;;  %v3753_v15 = vpop.eup %2508 }
 0x40d   : > { %v1224_v44 = vmul.f32 1.442695, %v1125_v37  ;;  %v1520_v41 = vmul.f32 %v4423_v14, %v1519_v28  ;;  %v1521_v56 = vmul.f32 %v4424_v32, %v1519_v28  ;;  %v1503_v31 = vsel %vm1500_vm7, %v1502_v0, %v1498_v45  ;;  %vm3720_vm8 = vmor %vm1479_vm6, %vm1480_vm5  ;;  %v4431_v0 = vld [vmem:[#allocation14_spill] sm:$0xff]  ;;  %v4436_v14 = vld [vmem:[#allocation19_spill] sm:$0xff] }
 0x40e   : > { %v1428_v18 = vsub.f32 1.0, %v1427_v7  ;;  %v1462_v43 = vadd.f32 %v3625_v8, %v1461_v33  ;;  %vm1464_vm9 = vweird.f32 %v3625_v8  ;;  %v1486_v27 = vor.u32 1.1754944e-38, %v1485_v25 }
 0x40f   : > { %1895 = vmatpush.xpose.msrb.mxu0 %v1552_v39  ;;  %1936 = vmatpush.xpose.msrb.mxu1 %v1553_v30  ;;  %v1445_v1 = vmul.f32 %v3662_v61, %v1444_v60  ;;  %v1411_v29 = vmul.f32 %v3711_v57, %v3357_v35  ;;  %v1482_v23 = vsel %vm3720_vm8, %v3608_v26, %v1478_v11  ;;  %vm1463_vm10 = vweird.f32 %v3317_v53  ;;  %v4428_v39 = vld [vmem:[#allocation13_spill] sm:$0xff] }
 0x410   : > { %v1469_v34 = vand.u32 2147483648, %v3317_v53  ;;  %2510 = vpow2.f32 %v1222_v6  ;;  %v1467_v3 = vand.u32 2147483647, %v3317_v53  ;;  %v1504_v49 = vmul.f32 %v4427_v20, %v1503_v31  ;;  %vm3741_vm12 = vmor %vm1463_vm10, %vm1464_vm9 }
 0x411   : > { %2512 = vpow2.f32 %v1224_v44  ;;  %v1505_v30 = vmul.f32 %v4428_v39, %v1503_v31  ;;  %vm1484_vm11 = vcmp.eq.f32.partialorder %v1483_v19, 8.507059e+37  ;;  %v1429_v26 = vmul.f32 %v3670_v21, %v1428_v18  ;;  %v4435_v19 = vld [vmem:[#allocation18_spill] sm:$0xff] }
 0x412   : > { %v1487_v5 = vsel %vm1484_vm11, %v1486_v27, %v1482_v23  ;;  %v1466_v9 = vsel %vm3741_vm12, %v3625_v8, %v1462_v43  ;;  %v1412_v53 = vsub.f32 1.0, %v1411_v29  ;;  %v1395_v46 = vmul.f32 %v3732_v50, %v3361_v36  ;;  %v4440_v23 = vld [vmem:[#allocation21_spill] sm:$0xff] }
 0x413   : > { %1896 = vmatpush.xpose.msrb.mxu0 %v1536_v62  ;;  %1937 = vmatpush.xpose.msrb.mxu1 %v1537_v40  ;;  %v1446_v4 = vadd.f32 %v3662_v61, %v1445_v1  ;;  %vm1448_vm13 = vweird.f32 %v3662_v61  ;;  %v1470_v47 = vor.u32 1.1754944e-38, %v1469_v34  ;;  %v1453_v10 = vand.u32 2147483648, %v3341_v22  ;;  %v4439_v1 = vld [vmem:[#allocation20_spill] sm:$0xff] }
 0x414   : > { %vm1468_vm14 = vcmp.eq.f32.partialorder %v1467_v3, 8.507059e+37  ;;  %vm1447_vm15 = vweird.f32 %v3341_v22  ;;  %v1488_v8 = vmul.f32 %v4431_v0, %v1487_v5  ;;  %v1489_v12 = vmul.f32 %v4432_v58, %v1487_v5  ;;  %v3773_v22 = vpop.xlane.xlu0 %1349 }
 0x415   : > { %v1471_v37 = vsel %vm1468_vm14, %v1470_v47, %v1466_v9  ;;  %vm3762_vm0 = vmor %vm1447_vm15, %vm1448_vm13  ;;  %v1430_v40 = vadd.f32 %v3670_v21, %v1429_v26  ;;  %vm1432_vm1 = vweird.f32 %v3670_v21  ;;  %v1413_v33 = vmul.f32 %v3711_v57, %v1412_v53  ;;  %v4443_v9 = vld [vmem:[#allocation22_spill] sm:$0xff] }
 0x416   : > { %v3760_v17 = vpop.eup %2510  ;;  %v1396_v7 = vsub.f32 1.0, %v1395_v46  ;;  %v1379_v28 = vmul.f32 %v3753_v15, %v3368_v52  ;;  %v1450_v25 = vsel %vm3762_vm0, %v3662_v61, %v1446_v4  ;;  %v1454_v60 = vor.u32 1.1754944e-38, %v1453_v10  ;;  %v4444_v46 = vld [vmem:[#allocation23_spill] sm:$0xff] }
 0x417   : > { %1897 = vmatpush.xpose.msrb.mxu0 %v1520_v41  ;;  %1938 = vmatpush.xpose.msrb.mxu1 %v1521_v56  ;;  %v3768_v45 = vpop.eup %2512  ;;  %vm1431_vm2 = vweird.f32 %v3351_v24  ;;  %v1437_v11 = vand.u32 2147483648, %v3351_v24  ;;  %v1435_v6 = vand.u32 2147483647, %v3351_v24  ;;  %v1472_v44 = vmul.f32 %v4435_v19, %v1471_v37  ;;  %v583_v19 = vpop.f32.mrf.mxu1 }
 0x418   : > { %v1473_v41 = vmul.f32 %v4436_v14, %v1471_v37  ;;  %vm1452_vm3 = vcmp.eq.f32.partialorder %v1451_v2, 8.507059e+37  ;;  %vm3785_vm4 = vmor %vm1431_vm2, %vm1432_vm1  ;;  %v1333_v61 = vadd.f32 %v3768_v45, %v3760_v17  ;;  %v1397_v24 = vmul.f32 %v3732_v50, %v1396_v7  ;;  %v4447_v7 = vld [vmem:[#allocation26_spill] sm:$0xff]  ;;  %v4450_v14 = vld [vmem:[#allocation29_spill] sm:$0xff] }
 0x419   : > { %v1455_v56 = vsel %vm1452_vm3, %v1454_v60, %v1450_v25  ;;  %v1434_v31 = vsel %vm3785_vm4, %v3670_v21, %v1430_v40  ;;  %v1380_v18 = vsub.f32 1.0, %v1379_v28  ;;  %v1414_v55 = vadd.f32 %v3711_v57, %v1413_v33  ;;  %v4448_v25 = vld [vmem:[#allocation27_spill] sm:$0xff] }
 0x41a   : > { %vm1416_vm5 = vweird.f32 %v3711_v57  ;;  %v1438_v43 = vor.u32 1.1754944e-38, %v1437_v11  ;;  %v1421_v27 = vand.u32 2147483648, %v3357_v35  ;;  %vm1436_vm6 = vcmp.eq.f32.partialorder %v1435_v6, 8.507059e+37  ;;  %v542_v6 = vpop.f32.mrf.mxu0 }
 0x41b   : > { %1898 = vmatpush.xpose.msrb.mxu0 %v1504_v49  ;;  %1939 = vmatpush.xpose.msrb.mxu1 %v1505_v30  ;;  %vm1415_vm7 = vweird.f32 %v3357_v35  ;;  %v1456_v29 = vmul.f32 %v4439_v1, %v1455_v56  ;;  %v1457_v21 = vmul.f32 %v4440_v23, %v1455_v56  ;;  %v1419_v34 = vand.u32 2147483647, %v3357_v35 }
 0x41c   : > { %v1439_v3 = vsel %vm1436_vm6, %v1438_v43, %v1434_v31  ;;  %vm3802_vm8 = vmor %vm1415_vm7, %vm1416_vm5  ;;  %v1381_v49 = vmul.f32 %v3753_v15, %v1380_v18  ;;  %v1398_v30 = vadd.f32 %v3732_v50, %v1397_v24  ;;  %vm1400_vm9 = vweird.f32 %v3732_v50  ;;  %v3815_v5 = vpop.xlane.xlu0 %1352 }
 0x41d   : > { %v1418_v39 = vsel %vm3802_vm8, %v3711_v57, %v1414_v55  ;;  %v1422_v48 = vor.u32 1.1754944e-38, %v1421_v27  ;;  %v1405_v35 = vand.u32 2147483648, %v3361_v36  ;;  %v1403_v26 = vand.u32 2147483647, %v3361_v36  ;;  %v479_v55 = vpop.permute.xlu2 %478 }
 0x41e   : > { %vm1399_vm10 = vweird.f32 %v3361_v36  ;;  %v1440_v53 = vmul.f32 %v4443_v9, %v1439_v3  ;;  %v1441_v4 = vmul.f32 %v4444_v46, %v1439_v3  ;;  %vm1420_vm11 = vcmp.eq.f32.partialorder %v1419_v34, 8.507059e+37 }
 0x41f   : > { %1899 = vmatpush.xpose.msrb.mxu0 %v1488_v8  ;;  %1940 = vmatpush.xpose.msrb.mxu1 %v1489_v12  ;;  %v1423_v47 = vsel %vm1420_vm11, %v1422_v48, %v1418_v39  ;;  %vm1401_vm12 = vmor %vm1399_vm10, %vm1400_vm9  ;;  %v1382_v10 = vadd.f32 %v3753_v15, %v1381_v49  ;;  %vm1384_vm13 = vweird.f32 %v3753_v15  ;;  %v1406_v0 = vor.u32 1.1754944e-38, %v1405_v35  ;;  %v4445_v8 = vld [vmem:[#allocation24_spill] sm:$0xff]  ;;  %v4446_v12 = vld [vmem:[#allocation25_spill] sm:$0xff]  ;;  %v586_v31 = vpop.f32.mrf.mxu1 }
 0x420   : > { %v1402_v57 = vsel %vm1401_vm12, %v3732_v50, %v1398_v30  ;;  %v1389_v36 = vand.u32 2147483648, %v3368_v52  ;;  %vm1404_vm14 = vcmp.eq.f32.partialorder %v1403_v26, 8.507059e+37  ;;  %vm1383_vm15 = vweird.f32 %v3368_v52 }
 0x421   : > { %v1424_v58 = vmul.f32 %v4445_v8, %v1423_v47  ;;  %v1425_v2 = vmul.f32 %v4446_v12, %v1423_v47  ;;  %v1387_v37 = vand.u32 2147483647, %v3368_v52  ;;  %v1407_v62 = vsel %vm1404_vm14, %v1406_v0, %v1402_v57  ;;  %vm1385_vm0 = vmor %vm1383_vm15, %vm1384_vm13  ;;  %v4449_v52 = vld [vmem:[#allocation28_spill] sm:$0xff] }
 0x422   : > { %v1386_v50 = vsel %vm1385_vm0, %v3753_v15, %v1382_v10  ;;  %v1390_v40 = vor.u32 1.1754944e-38, %v1389_v36  ;;  %v1408_v28 = vmul.f32 %v4447_v7, %v1407_v62  ;;  %v1409_v60 = vmul.f32 %v4448_v25, %v1407_v62  ;;  %v545_v56 = vpop.f32.mrf.mxu0 }
 0x423   : > { %1900 = vmatpush.xpose.msrb.mxu0 %v1472_v44  ;;  %1941 = vmatpush.xpose.msrb.mxu1 %v1473_v41  ;;  %vm1388_vm1 = vcmp.eq.f32.partialorder %v1387_v37, 8.507059e+37  ;;  %v3835_v15 = vadd.f32 %v542_v6, %v3372_v63  ;;  %v3838_v32 = vadd.f32 %v583_v19, %v3372_v63  ;;  %v3845_v24 = vadd.f32 %v545_v56, %v3370_v16 }
 0x424   : > { %1334 = vadd.xlane.f32.xlu0 %v1333_v61  ;;  %v1391_v11 = vsel %vm1388_vm1, %v1390_v40, %v1386_v50  ;;  %v3848_v18 = vadd.f32 %v586_v31, %v3370_v16 }
 0x425   : > { %v1392_v44 = vmul.f32 %v4449_v52, %v1391_v11  ;;  %v1393_v41 = vmul.f32 %v4450_v14, %v1391_v11 }
 0x427   : > { %1901 = vmatpush.xpose.msrb.mxu0 %v1456_v29  ;;  %1942 = vmatpush.xpose.msrb.mxu1 %v1457_v21  ;;  %v589_v27 = vpop.f32.mrf.mxu1 }
 0x428   : > { %v3858_v29 = vadd.f32 %v589_v27, %v3381_v38  ;;  %v3860_v23 = vpop.xlane.xlu2 %1355 }
 0x429   : > { %v3828_v33 = vpop.xlane.xlu0 %1358 }
 0x42a   : > { %v548_v63 = vpop.f32.mrf.mxu0 }
 0x42b   : > { %1902 = vmatpush.xpose.msrb.mxu0 %v1440_v53  ;;  %1943 = vmatpush.xpose.msrb.mxu1 %v1441_v4  ;;  %v3855_v1 = vadd.f32 %v548_v63, %v3381_v38  ;;  %v3933_v63 = vpop.xlane.xlu1 %1337 }
 0x42f   : > { %1903 = vmatpush.xpose.msrb.mxu0 %v1424_v58  ;;  %1944 = vmatpush.xpose.msrb.mxu1 %v1425_v2  ;;  %v592_v34 = vpop.f32.mrf.mxu1 }
 0x430   : > { %v3868_v20 = vadd.f32 %v592_v34, %v479_v55  ;;  %v3875_v38 = vpop.xlane.xlu2 %1367 }
 0x431   : > { %v1837_v6 = vand.u32 2147483648, %v3875_v38  ;;  %vm1831_vm14 = vweird.f32 %v3875_v38 }
 0x432   : > { %v551_v16 = vpop.f32.mrf.mxu0 }
 0x433   : > { %1904 = vmatpush.xpose.msrb.mxu0 %v1408_v28  ;;  %1945 = vmatpush.xpose.msrb.mxu1 %v1409_v60  ;;  %v3866_v3 = vadd.f32 %v551_v16, %v479_v55  ;;  %v1838_v56 = vor.u32 1.1754944e-38, %v1837_v6 }
 0x437   : > { %1905 = vmatpush.xpose.msrb.mxu0 %v1392_v44  ;;  %1946 = vmatpush.xpose.msrb.mxu1 %v1393_v41  ;;  %v595_v2 = vpop.f32.mrf.mxu1 }
 0x438   : > { %v3917_v19 = vpop.xlane.xlu2 %1340 }
 0x439   : > { %v3840_v61 = vpop.xlane.xlu0 %1361 }
 0x43a   : > { %1906 = vmatmul.f32.vlgmr.msrb.gmra.mxu0 %v3835_v15  ;;  %1947 = vmatmul.f32.vlgmr.msrb.gmra.mxu1 %v3838_v32  ;;  %v554_v58 = vpop.f32.mrf.mxu0 }
 0x441   : > { %v3850_v43 = vpop.xlane.xlu0 %1364 }
 0x442   : > { %1909 = vmatmul.f32.gmra.mxu0 %v3845_v24  ;;  %1950 = vmatmul.f32.gmra.mxu1 %v3848_v18  ;;  %v1821_v6 = vand.u32 2147483648, %v3850_v43 }
 0x449   : > { %v3862_v21 = vpop.xlane.xlu0 %1370 }
 0x44a   : > { %1912 = vmatmul.f32.gmra.mxu0 %v3855_v1  ;;  %1953 = vmatmul.f32.gmra.mxu1 %v3858_v29  ;;  %vm1847_vm10 = vweird.f32 %v3862_v21 }
 0x451   : > { %v3870_v49 = vpop.xlane.xlu0 %1373 }
 0x452   : > { %2514 = vrcp.f32 %v3870_v49  ;;  %1915 = vmatmul.f32.gmra.mxu0 %v3866_v3  ;;  %1956 = vmatmul.f32.gmra.mxu1 %v3868_v20  ;;  %vm1863_vm4 = vweird.f32 %v3870_v49  ;;  %v1869_v52 = vand.u32 2147483648, %v3870_v49  ;;  %v1867_v31 = vand.u32 2147483647, %v3870_v49 }
 0x453   : > { %2516 = vrcp.f32 %v3862_v21 }
 0x454   : > { %2518 = vrcp.f32 %v3875_v38  ;;  %vm1868_vm11 = vcmp.eq.f32.partialorder %v1867_v31, 8.507059e+37  ;;  %v3976_v31 = vpop.xlane.xlu2 %1331 }
 0x458   : > { %v3879_v39 = vpop.eup %2514 }
 0x459   : > { %v3881_v30 = vpop.eup %2516  ;;  %v1859_v48 = vmul.f32 %v3879_v39, %v3870_v49  ;;  %v1377_v35 = vpop.xlane.xlu0 %1376  ;;  %vm1864_vm2 = vweird.f32 %v3879_v39 }
 0x45a   : > { %2520 = vrcp.f32 %v1377_v35  ;;  %v3886_v26 = vpop.eup %2518  ;;  %v1843_v9 = vmul.f32 %v3881_v30, %v3862_v21  ;;  %v1885_v50 = vand.u32 2147483648, %v1377_v35  ;;  %v1883_v28 = vand.u32 2147483647, %v1377_v35  ;;  %vm3926_vm6 = vmor %vm1863_vm4, %vm1864_vm2 }
 0x45b   : > { %2522 = vrcp.f32 %v3850_v43  ;;  %v1860_v53 = vsub.f32 1.0, %v1859_v48  ;;  %v1827_v46 = vmul.f32 %v3886_v26, %v3875_v38  ;;  %vm1879_vm5 = vweird.f32 %v1377_v35 }
 0x45c   : > { %2524 = vrcp.f32 %v3828_v33  ;;  %v1844_v47 = vsub.f32 1.0, %v1843_v9  ;;  %v1886_v34 = vor.u32 1.1754944e-38, %v1885_v50  ;;  %vm1848_vm8 = vweird.f32 %v3881_v30  ;;  %v557_v50 = vpop.f32.mrf.mxu0 }
 0x45d   : > { %2526 = vrcp.f32 %v3840_v61  ;;  %v1861_v10 = vmul.f32 %v3879_v39, %v1860_v53  ;;  %v1828_v8 = vsub.f32 1.0, %v1827_v46  ;;  %vm1884_vm9 = vcmp.eq.f32.partialorder %v1883_v28, 8.507059e+37  ;;  %vm3953_vm12 = vmor %vm1847_vm10, %vm1848_vm8  ;;  %v598_v28 = vpop.f32.mrf.mxu1 }
 0x45e   : > { %2528 = vrcp.f32 %v3655_v59  ;;  %v1845_v62 = vmul.f32 %v3881_v30, %v1844_v47  ;;  %v1853_v53 = vand.u32 2147483648, %v3862_v21  ;;  %v1870_v46 = vor.u32 1.1754944e-38, %v1869_v52 }
 0x45f   : > { %2530 = vrcp.f32 %v3773_v22  ;;  %v1862_v25 = vadd.f32 %v3879_v39, %v1861_v10  ;;  %v1829_v14 = vmul.f32 %v3886_v26, %v1828_v8  ;;  %v1851_v8 = vand.u32 2147483647, %v3862_v21 }
 0x460   : > { %v2521_v4 = vpop.eup %2520  ;;  %2532 = vrcp.f32 %v3815_v5  ;;  %v1846_v9 = vadd.f32 %v3881_v30, %v1845_v62  ;;  %vm1832_vm13 = vweird.f32 %v3886_v26  ;;  %v1835_v52 = vand.u32 2147483647, %v3875_v38 }
 0x461   : > { %v3895_v57 = vpop.eup %2522  ;;  %v1875_v0 = vmul.f32 %v2521_v4, %v1377_v35  ;;  %2534 = vrcp.f32 %v3860_v23  ;;  %vm1880_vm3 = vweird.f32 %v2521_v4  ;;  %v1866_v49 = vsel %vm3926_vm6, %v3879_v39, %v1862_v25  ;;  %vm3980_vm0 = vmor %vm1831_vm14, %vm1832_vm13 }
 0x462   : > { %v3900_v36 = vpop.eup %2524  ;;  %v1811_v37 = vmul.f32 %v3895_v57, %v3850_v43  ;;  %vm1881_vm7 = vmor %vm1879_vm5, %vm1880_vm3  ;;  %v1830_v62 = vadd.f32 %v3886_v26, %v1829_v14  ;;  %2536 = vrcp.f32 %v3715_v13  ;;  %v1854_v25 = vor.u32 1.1754944e-38, %v1853_v53  ;;  %v4459_v53 = vld [vmem:[#allocation54_spill] sm:$0xff] }
 0x463   : > { %v1876_v12 = vsub.f32 1.0, %v1875_v0  ;;  %v3907_v40 = vpop.eup %2526  ;;  %v3914_v11 = vmul.f32 %v3900_v36, %v3828_v33  ;;  %vm1852_vm15 = vcmp.eq.f32.partialorder %v1851_v8, 8.507059e+37  ;;  %vm1816_vm1 = vweird.f32 %v3895_v57 }
 0x464   : > { %v3910_v60 = vpop.eup %2528  ;;  %v1795_v27 = vmul.f32 %v3907_v40, %v3840_v61  ;;  %v1812_v16 = vsub.f32 1.0, %v1811_v37  ;;  %v1871_v37 = vsel %vm1868_vm11, %v1870_v46, %v1866_v49  ;;  %vm1815_vm2 = vweird.f32 %v3850_v43  ;;  %v4458_v49 = vld [vmem:[#allocation53_spill] sm:$0xff] }
 0x465   : > { %v1877_v7 = vmul.f32 %v2521_v4, %v1876_v12  ;;  %v3921_v44 = vpop.eup %2530  ;;  %vm1836_vm3 = vcmp.eq.f32.partialorder %v1835_v52, 8.507059e+37  ;;  %vm4003_vm4 = vmor %vm1815_vm2, %vm1816_vm1  ;;  %vm1800_vm5 = vweird.f32 %v3907_v40  ;;  %vm1799_vm6 = vweird.f32 %v3840_v61 }
 0x466   : > { %v3931_v55 = vpop.eup %2532  ;;  %vm4031_vm8 = vmor %vm1799_vm6, %vm1800_vm5  ;;  %vm1783_vm10 = vweird.f32 %v3828_v33  ;;  %2538 = vrcp.f32 %v3917_v19  ;;  %vm1767_vm14 = vweird.f32 %v3860_v23  ;;  %vm1736_vm5 = vweird.f32 %v3921_v44 }
 0x467   : > { %v1878_v41 = vadd.f32 %v2521_v4, %v1877_v7  ;;  %v3939_v48 = vpop.eup %2534  ;;  %v1850_v7 = vsel %vm3953_vm12, %v3881_v30, %v1846_v9  ;;  %2540 = vrcp.f32 %v3933_v63  ;;  %vm1752_vm2 = vweird.f32 %v3931_v55 }
 0x468   : > { %v1763_v30 = vmul.f32 %v3939_v48, %v3860_v23  ;;  %vm1768_vm13 = vweird.f32 %v3939_v48  ;;  %vm1735_vm6 = vweird.f32 %v3773_v22  ;;  %2542 = vrcp.f32 %v3976_v31 }
 0x469   : > { %v1882_v35 = vsel %vm1881_vm7, %v2521_v4, %v1878_v41  ;;  %v1813_v4 = vmul.f32 %v3895_v57, %v1812_v16  ;;  %v1780_v41 = vsub.f32 1.0, %v3914_v11  ;;  %v1855_v16 = vsel %vm1852_vm15, %v1854_v25, %v1850_v7  ;;  %v560_v7 = vpop.f32.mrf.mxu0  ;;  %vm4074_vm1 = vmor %vm1767_vm14, %vm1768_vm13 }
 0x46a   : > { %v1887_v47 = vsel %vm1884_vm9, %v1886_v34, %v1882_v35  ;;  %v1834_v34 = vsel %vm3980_vm0, %v3886_v26, %v1830_v62  ;;  %v1819_v35 = vand.u32 2147483647, %v3850_v43  ;;  %v1856_v9 = vmul.f32 %v4458_v49, %v1855_v16  ;;  %v3999_v26 = vpop.eup %2536 }
 0x46b   : > { %v1888_v10 = vmul.f32 %v3490_v54, %v1887_v47  ;;  %v1889_v0 = vmul.f32 %v3493_v51, %v1887_v47  ;;  %v1796_v54 = vsub.f32 1.0, %v1795_v27  ;;  %v489_v27 = vpop.permute.xlu1 %488  ;;  %v1814_v11 = vadd.f32 %v3895_v57, %v1813_v4 }
 0x46c   : > { %v484_v12 = vpop.permute.xlu0 %483  ;;  %v1857_v46 = vmul.f32 %v4459_v53, %v1855_v16  ;;  %v3995_v47 = vadd.f32 %v557_v50, %v489_v27  ;;  %v1764_v8 = vsub.f32 1.0, %v1763_v30  ;;  %v1839_v4 = vsel %vm1836_vm3, %v1838_v56, %v1834_v34 }
 0x46d   : > { %1972 = vmatpush.xpose.msra.mxu0 %v1888_v10  ;;  %2013 = vmatpush.xpose.msra.mxu1 %v1889_v0  ;;  %v3959_v51 = vadd.f32 %v554_v58, %v484_v12  ;;  %v3961_v21 = vadd.f32 %v595_v2, %v484_v12  ;;  %v1872_v58 = vmul.f32 %v3479_v42, %v1871_v37  ;;  %v4455_v2 = vld [vmem:[#allocation55_spill] sm:$0xff]  ;;  %v1822_v50 = vor.u32 1.1754944e-38, %v1821_v6  ;;  %v494_v6 = vpop.permute.xlu2 %493 }
 0x46e   : > { %v1873_v14 = vmul.f32 %v4455_v2, %v1871_v37  ;;  %v1797_v42 = vmul.f32 %v3907_v40, %v1796_v54  ;;  %v3997_v10 = vadd.f32 %v598_v28, %v489_v27  ;;  %v1747_v0 = vmul.f32 %v3931_v55, %v3815_v5  ;;  %v4462_v28 = vld [vmem:[#allocation43_spill] sm:$0xff] }
 0x46f   : > { %1918 = vmatmul.f32.gmra.mxu0 %v3959_v51  ;;  %1959 = vmatmul.f32.gmra.mxu1 %v3961_v21  ;;  %v1781_v43 = vmul.f32 %v3900_v36, %v1780_v41  ;;  %v1818_v37 = vsel %vm4003_vm4, %v3895_v57, %v1814_v11  ;;  %v1731_v62 = vmul.f32 %v3921_v44, %v3773_v22  ;;  %v1805_v54 = vand.u32 2147483648, %v3840_v61  ;;  %v4463_v57 = vld [vmem:[#allocation44_spill] sm:$0xff]  ;;  %v601_v41 = vpop.f32.mrf.mxu1 }
 0x470   : > { %v1798_v39 = vadd.f32 %v3907_v40, %v1797_v42  ;;  %v1840_v25 = vmul.f32 %v4462_v28, %v1839_v4  ;;  %v1841_v52 = vmul.f32 %v4463_v57, %v1839_v4  ;;  %vm1820_vm7 = vcmp.eq.f32.partialorder %v1819_v35, 8.507059e+37  ;;  %v4466_v35 = vld [vmem:[#allocation51_spill] sm:$0xff]  ;;  %v4471_v28 = vld [vmem:[#allocation48_spill] sm:$0xff] }
 0x471   : > { %1973 = vmatpush.xpose.msra.mxu0 %v1872_v58  ;;  %2014 = vmatpush.xpose.msra.mxu1 %v1873_v14  ;;  %v1803_v58 = vand.u32 2147483647, %v3840_v61  ;;  %v4024_v2 = vmul.f32 %v3910_v60, %v3655_v59  ;;  %v1748_v14 = vsub.f32 1.0, %v1747_v0  ;;  %v1765_v30 = vmul.f32 %v3939_v48, %v1764_v8 }
 0x472   : > { %v1823_v56 = vsel %vm1820_vm7, %v1822_v50, %v1818_v37  ;;  %v1715_v16 = vmul.f32 %v3999_v26, %v3715_v13  ;;  %v1802_v38 = vsel %vm4031_vm8, %v3907_v40, %v1798_v39  ;;  %v1782_v42 = vadd.f32 %v3900_v36, %v1781_v43  ;;  %v4470_v50 = vld [vmem:[#allocation47_spill] sm:$0xff] }
 0x473   : > { %vm1784_vm9 = vweird.f32 %v3900_v36  ;;  %v1732_v34 = vsub.f32 1.0, %v1731_v62  ;;  %v1789_v61 = vand.u32 2147483648, %v3828_v33  ;;  %v1806_v11 = vor.u32 1.1754944e-38, %v1805_v54 }
 0x474   : > { %v1824_v49 = vmul.f32 %v4466_v35, %v1823_v56  ;;  %vm1804_vm11 = vcmp.eq.f32.partialorder %v1803_v58, 8.507059e+37  ;;  %v1749_v40 = vmul.f32 %v3931_v55, %v1748_v14  ;;  %vm4049_vm12 = vmor %vm1783_vm10, %vm1784_vm9  ;;  %v1766_v4 = vadd.f32 %v3939_v48, %v1765_v30  ;;  %v499_v58 = vpop.permute.xlu1 %498 }
 0x475   : > { %1974 = vmatpush.xpose.msra.mxu0 %v1856_v9  ;;  %2015 = vmatpush.xpose.msra.mxu1 %v1857_v46  ;;  %v4467_v9 = vld [vmem:[#allocation52_spill] sm:$0xff]  ;;  %v1787_v46 = vand.u32 2147483647, %v3828_v33  ;;  %v1807_v0 = vsel %vm1804_vm11, %v1806_v11, %v1802_v38  ;;  %v4054_v12 = vadd.f32 %v560_v7, %v494_v6  ;;  %v4056_v43 = vadd.f32 %v601_v41, %v494_v6  ;;  %vm4119_vm9 = vmor %vm1735_vm6, %vm1736_vm5 }
 0x476   : > { %v1825_v53 = vmul.f32 %v4467_v9, %v1823_v56  ;;  %v1786_v33 = vsel %vm4049_vm12, %v3900_v36, %v1782_v42  ;;  %v1700_v37 = vsub.f32 1.0, %v4024_v2  ;;  %v1773_v39 = vand.u32 2147483648, %v3860_v23  ;;  %v563_v36 = vpop.f32.mrf.mxu0  ;;  %v4084_v56 = vpop.eup %2538  ;;  %v4474_v42 = vld [vmem:[#allocation41_spill] sm:$0xff] }
 0x477   : > { %1921 = vmatmul.f32.gmra.mxu0 %v3995_v47  ;;  %1962 = vmatmul.f32.gmra.mxu1 %v3997_v10  ;;  %v1790_v62 = vor.u32 1.1754944e-38, %v1789_v61  ;;  %v1771_v54 = vand.u32 2147483647, %v3860_v23  ;;  %v1808_v7 = vmul.f32 %v4470_v50, %v1807_v0  ;;  %vm1788_vm15 = vcmp.eq.f32.partialorder %v1787_v46, 8.507059e+37  ;;  %v4475_v61 = vld [vmem:[#allocation42_spill] sm:$0xff]  ;;  %v4483_v23 = vld [vmem:[#allocation39_spill] sm:$0xff] }
 0x478   : > { %v1716_v57 = vsub.f32 1.0, %v1715_v16  ;;  %vm1751_vm0 = vweird.f32 %v3815_v5  ;;  %v1733_v14 = vmul.f32 %v3921_v44, %v1732_v34  ;;  %v1770_v30 = vsel %vm4074_vm1, %v3939_v48, %v1766_v4 }
 0x479   : > { %1975 = vmatpush.xpose.msra.mxu0 %v1840_v25  ;;  %2016 = vmatpush.xpose.msra.mxu1 %v1841_v52  ;;  %v1809_v25 = vmul.f32 %v4471_v28, %v1807_v0  ;;  %v604_v52 = vpop.f32.mrf.mxu1  ;;  %v1791_v2 = vsel %vm1788_vm15, %v1790_v62, %v1786_v33  ;;  %v1750_v41 = vadd.f32 %v3931_v55, %v1749_v40  ;;  %v1757_v27 = vand.u32 2147483648, %v3815_v5  ;;  %vm4097_vm4 = vmor %vm1751_vm0, %vm1752_vm2  ;;  %v4108_v0 = vpop.eup %2540  ;;  %v4478_v33 = vld [vmem:[#allocation10_spill] sm:$0xff] }
 0x47a   : > { %v1774_v16 = vor.u32 1.1754944e-38, %v1773_v39  ;;  %vm1772_vm3 = vcmp.eq.f32.partialorder %v1771_v54, 8.507059e+37  ;;  %v1755_v38 = vand.u32 2147483647, %v3815_v5  ;;  %v1792_v34 = vmul.f32 %v4474_v42, %v1791_v2 }
 0x47b   : > { %v1793_v11 = vmul.f32 %v4475_v61, %v1791_v2  ;;  %v4090_v6 = vadd.f32 %v563_v36, %v499_v58  ;;  %v4092_v35 = vadd.f32 %v604_v52, %v499_v58  ;;  %v1717_v48 = vmul.f32 %v3999_v26, %v1716_v57  ;;  %v4482_v58 = vld [vmem:[#allocation38_spill] sm:$0xff] }
 0x47c   : > { %v1754_v46 = vsel %vm4097_vm4, %v3931_v55, %v1750_v41  ;;  %v1734_v40 = vadd.f32 %v3921_v44, %v1733_v14  ;;  %v1701_v5 = vmul.f32 %v3910_v60, %v1700_v37  ;;  %v1741_v8 = vand.u32 2147483648, %v3773_v22  ;;  %v4479_v55 = vld [vmem:[#allocation40_spill] sm:$0xff] }
 0x47d   : > { %1976 = vmatpush.xpose.msra.mxu0 %v1824_v49  ;;  %2017 = vmatpush.xpose.msra.mxu1 %v1825_v53  ;;  %v1775_v49 = vsel %vm1772_vm3, %v1774_v16, %v1770_v30  ;;  %v1683_v53 = vmul.f32 %v4084_v56, %v3917_v19  ;;  %v1758_v4 = vor.u32 1.1754944e-38, %v1757_v27  ;;  %vm1756_vm7 = vcmp.eq.f32.partialorder %v1755_v38, 8.507059e+37 }
 0x47e   : > { %v1776_v39 = vmul.f32 %v4478_v33, %v1775_v49  ;;  %v1777_v62 = vmul.f32 %v4479_v55, %v1775_v49  ;;  %v1739_v54 = vand.u32 2147483647, %v3773_v22  ;;  %vm1719_vm8 = vweird.f32 %v3715_v13  ;;  %v4489_v33 = vld [vmem:[#allocation33_spill] sm:$0xff]  ;;  %v2543_v55 = vpop.eup %2542 }
 0x47f   : > { %1924 = vmatmul.f32.gmra.mxu0 %v4054_v12  ;;  %1965 = vmatmul.f32.gmra.mxu1 %v4056_v43  ;;  %v1759_v50 = vsel %vm1756_vm7, %v1758_v4, %v1754_v46  ;;  %vm1720_vm10 = vweird.f32 %v3999_v26  ;;  %v1684_v28 = vsub.f32 1.0, %v1683_v53  ;;  %v1718_v22 = vadd.f32 %v3999_v26, %v1717_v48  ;;  %v4487_v48 = vld [vmem:[#allocation35_spill] sm:$0xff] }
 0x480   : > { %v1725_v36 = vand.u32 2147483648, %v3715_v13  ;;  %v1742_v57 = vor.u32 1.1754944e-38, %v1741_v8  ;;  %v1723_v52 = vand.u32 2147483647, %v3715_v13  ;;  %vm1704_vm11 = vweird.f32 %v3910_v60  ;;  %vm4142_vm14 = vmor %vm1719_vm8, %vm1720_vm10  ;;  %v4486_v13 = vld [vmem:[#allocation34_spill] sm:$0xff]  ;;  %v4488_v8 = vld [vmem:[#allocation32_spill] sm:$0xff] }
 0x481   : > { %1977 = vmatpush.xpose.msra.mxu0 %v1808_v7  ;;  %2018 = vmatpush.xpose.msra.mxu1 %v1809_v25  ;;  %v1667_v7 = vmul.f32 %v4108_v0, %v3933_v63  ;;  %v1738_v25 = vsel %vm4119_vm9, %v3921_v44, %v1734_v40  ;;  %v1760_v2 = vmul.f32 %v4482_v58, %v1759_v50  ;;  %vm1740_vm12 = vcmp.eq.f32.partialorder %v1739_v54, 8.507059e+37 }
 0x482   : > { %v1761_v14 = vmul.f32 %v4483_v23, %v1759_v50  ;;  %v1702_v30 = vadd.f32 %v3910_v60, %v1701_v5  ;;  %vm1703_vm13 = vweird.f32 %v3655_v59  ;;  %v1709_v44 = vand.u32 2147483648, %v3655_v59 }
 0x483   : > { %v1743_v41 = vsel %vm1740_vm12, %v1742_v57, %v1738_v25  ;;  %v1668_v16 = vsub.f32 1.0, %v1667_v7  ;;  %v1685_v38 = vmul.f32 %v4084_v56, %v1684_v28  ;;  %v1722_v42 = vsel %vm4142_vm14, %v3999_v26, %v1718_v22  ;;  %vm1705_vm15 = vmor %vm1703_vm13, %vm1704_vm11  ;;  %v4492_v7 = vld [vmem:[#allocation30_spill] sm:$0xff] }
 0x484   : > { %v1726_v61 = vor.u32 1.1754944e-38, %v1725_v36  ;;  %v1745_v49 = vmul.f32 %v4487_v48, %v1743_v41  ;;  %vm1724_vm0 = vcmp.eq.f32.partialorder %v1723_v52, 8.507059e+37  ;;  %v1706_v9 = vsel %vm1705_vm15, %v3910_v60, %v1702_v30  ;;  %v4493_v36 = vld [vmem:[#allocation31_spill] sm:$0xff] }
 0x485   : > { %1978 = vmatpush.xpose.msra.mxu0 %v1792_v34  ;;  %2019 = vmatpush.xpose.msra.mxu1 %v1793_v11  ;;  %v1707_v34 = vand.u32 2147483647, %v3655_v59  ;;  %v1744_v11 = vmul.f32 %v4486_v13, %v1743_v41  ;;  %v1710_v53 = vor.u32 1.1754944e-38, %v1709_v44  ;;  %v1669_v40 = vmul.f32 %v4108_v0, %v1668_v16  ;;  %v4495_v44 = vld [vmem:[#allocation46_spill] sm:$0xff] }
 0x486   : > { %v1727_v46 = vsel %vm1724_vm0, %v1726_v61, %v1722_v42  ;;  %v1686_v59 = vadd.f32 %v4084_v56, %v1685_v38  ;;  %vm1688_vm2 = vweird.f32 %v4084_v56  ;;  %v1693_v26 = vand.u32 2147483648, %v3917_v19  ;;  %v4496_v42 = vld [vmem:[#allocation36_spill] sm:$0xff]  ;;  %v4497_v61 = vld [vmem:[#allocation37_spill] sm:$0xff] }
 0x487   : > { %1927 = vmatmul.f32.gmra.mxu0 %v4090_v6  ;;  %1968 = vmatmul.f32.gmra.mxu1 %v4092_v35  ;;  %vm1708_vm1 = vcmp.eq.f32.partialorder %v1707_v34, 8.507059e+37  ;;  %vm1687_vm3 = vweird.f32 %v3917_v19  ;;  %v1728_v4 = vmul.f32 %v4488_v8, %v1727_v46  ;;  %v1729_v60 = vmul.f32 %v4489_v33, %v1727_v46 }
 0x488   : > { %v1711_v5 = vsel %vm1708_vm1, %v1710_v53, %v1706_v9  ;;  %vm4165_vm4 = vmor %vm1687_vm3, %vm1688_vm2  ;;  %v1670_v50 = vadd.f32 %v4108_v0, %v1669_v40  ;;  %vm1672_vm5 = vweird.f32 %v4108_v0  ;;  %vm1671_vm6 = vweird.f32 %v3933_v63 }
 0x489   : > { %1979 = vmatpush.xpose.msra.mxu0 %v1776_v39  ;;  %2020 = vmatpush.xpose.msra.mxu1 %v1777_v62  ;;  %v1691_v39 = vand.u32 2147483647, %v3917_v19  ;;  %v1690_v54 = vsel %vm4165_vm4, %v4084_v56, %v1686_v59  ;;  %v1677_v37 = vand.u32 2147483648, %v3933_v63  ;;  %v1694_v19 = vor.u32 1.1754944e-38, %v1693_v26  ;;  %vm1673_vm8 = vmor %vm1671_vm6, %vm1672_vm5  ;;  %v4498_v62 = vld [vmem:[#allocation49_spill] sm:$0xff] }
 0x48a   : > { %v1712_v28 = vmul.f32 %v4492_v7, %v1711_v5  ;;  %v1635_v25 = vmul.f32 %v2543_v55, %v3976_v31  ;;  %v1713_v57 = vmul.f32 %v4493_v36, %v1711_v5  ;;  %v1675_v52 = vand.u32 2147483647, %v3933_v63  ;;  %v2546_v7 = vld [vmem:[%s2805_s21] sm:$0xff] }
 0x48b   : > { %vm1692_vm7 = vcmp.eq.f32.partialorder %v1691_v39, 8.507059e+37  ;;  %v1674_v58 = vsel %vm1673_vm8, %v4108_v0, %v1670_v50  ;;  %vm1640_vm10 = vweird.f32 %v2543_v55  ;;  %vm1639_vm12 = vweird.f32 %v3976_v31 }
 0x48c   : > { %v1695_v56 = vsel %vm1692_vm7, %v1694_v19, %v1690_v54  ;;  %v1636_v23 = vsub.f32 1.0, %v1635_v25  ;;  %vm1676_vm9 = vcmp.eq.f32.partialorder %v1675_v52, 8.507059e+37  ;;  %v1645_v53 = vand.u32 2147483648, %v3976_v31  ;;  %vm1641_vm14 = vmor %vm1639_vm12, %vm1640_vm10 }
 0x48d   : > { %1980 = vmatpush.xpose.msra.mxu0 %v1760_v2  ;;  %2021 = vmatpush.xpose.msra.mxu1 %v1761_v14  ;;  %v1678_v2 = vor.u32 1.1754944e-38, %v1677_v37  ;;  %v4494_v14 = vld [vmem:[#allocation45_spill] sm:$0xff]  ;;  %v1697_v41 = vmul.f32 %v4495_v44, %v1695_v56  ;;  %v1643_v40 = vand.u32 2147483647, %v3976_v31  ;;  %v4499_v31 = vld [vmem:[#allocation50_spill] sm:$0xff]  ;;  %v4194_v37 = vpop.permute.xlu1 %2058 }
 0x48e   : > { %v1696_v30 = vmul.f32 %v4494_v14, %v1695_v56  ;;  %v1637_v38 = vmul.f32 %v2543_v55, %v1636_v23  ;;  %v1646_v8 = vor.u32 1.1754944e-38, %v1645_v53 }
 0x48f   : > { %v1679_v27 = vsel %vm1676_vm9, %v1678_v2, %v1674_v58  ;;  %vm1644_vm1 = vcmp.eq.f32.partialorder %v1643_v40, 8.507059e+37  ;;  %v2548_v58 = vld [vmem:[%s2805_s21 + $0x20] sm:$0xff] }
 0x490   : > { %v1680_v34 = vmul.f32 %v4496_v42, %v1679_v27  ;;  %v1681_v13 = vmul.f32 %v4497_v61, %v1679_v27  ;;  %v1638_v9 = vadd.f32 %v2543_v55, %v1637_v38 }
 0x491   : > { %1981 = vmatpush.xpose.msra.mxu0 %v1744_v11  ;;  %2022 = vmatpush.xpose.msra.mxu1 %v1745_v49 }
 0x492   : > { %v1642_v5 = vsel %vm1641_vm14, %v2543_v55, %v1638_v9 }
 0x493   : > { %v1647_v39 = vsel %vm1644_vm1, %v1646_v8, %v1642_v5 }
 0x494   : > { %v1648_v54 = vmul.f32 %v4498_v62, %v1647_v39  ;;  %v1649_v50 = vmul.f32 %v4499_v31, %v1647_v39  ;;  %v2555_v39 = vld [vmem:[%s2805_s21 + $0x18] sm:$0xff] }
 0x495   : > { %1982 = vmatpush.xpose.msra.mxu0 %v1728_v4  ;;  %2023 = vmatpush.xpose.msra.mxu1 %v1729_v60 }
 0x497   : > { %v1335_v22 = vpop.xlane.xlu0 %1334 }
 0x498   : > { %2544 = vrcp.f32 %v1335_v22  ;;  %v1661_v0 = vand.u32 2147483648, %v1335_v22  ;;  %v1659_v49 = vand.u32 2147483647, %v1335_v22  ;;  %vm1655_vm13 = vweird.f32 %v1335_v22 }
 0x499   : > { %1983 = vmatpush.xpose.msra.mxu0 %v1712_v28  ;;  %2024 = vmatpush.xpose.msra.mxu1 %v1713_v57 }
 0x49a   : > { %v1662_v59 = vor.u32 1.1754944e-38, %v1661_v0  ;;  %vm1660_vm0 = vcmp.eq.f32.partialorder %v1659_v49, 8.507059e+37  ;;  %v2553_v49 = vld [vmem:[%s2805_s21 + $0x70] sm:$0xff] }
 0x49d   : > { %1984 = vmatpush.xpose.msra.mxu0 %v1696_v30  ;;  %2025 = vmatpush.xpose.msra.mxu1 %v1697_v41  ;;  %v2549_v30 = vld [vmem:[%s2805_s21 + $0x30] sm:$0xff]  ;;  %v2550_v41 = vld [vmem:[%s2805_s21 + $0x40] sm:$0xff] }
 0x49e   : > { %v2545_v16 = vpop.eup %2544 }
 0x49f   : > { %v1651_v63 = vmul.f32 %v2545_v16, %v1335_v22  ;;  %vm1656_vm11 = vweird.f32 %v2545_v16 }
 0x4a0   : > { %vm1657_vm15 = vmor %vm1655_vm13, %vm1656_vm11 }
 0x4a1   : > { %v1652_v11 = vsub.f32 1.0, %v1651_v63  ;;  %1985 = vmatpush.xpose.msra.mxu0 %v1680_v34  ;;  %2026 = vmatpush.xpose.msra.mxu1 %v1681_v13  ;;  %v2552_v34 = vld [vmem:[%s2805_s21 + $0x60] sm:$0xff] }
 0x4a3   : > { %v1653_v48 = vmul.f32 %v2545_v16, %v1652_v11 }
 0x4a5   : > { %v1654_v46 = vadd.f32 %v2545_v16, %v1653_v48 }
 0x4a7   : > { %v1658_v26 = vsel %vm1657_vm15, %v2545_v16, %v1654_v46  ;;  %v2551_v16 = vld [vmem:[%s2805_s21 + $0x50] sm:$0xff] }
 0x4a8   : > { %v1663_v4 = vsel %vm1660_vm0, %v1662_v59, %v1658_v26  ;;  %v2554_v26 = vld [vmem:[%s2805_s21 + $0x8] sm:$0xff] }
 0x4a9   : > { %v1664_v33 = vmul.f32 %v3760_v17, %v1663_v4  ;;  %v1665_v60 = vmul.f32 %v3768_v45, %v1663_v4 }
 0x4ab   : > { %1986 = vmatpush.xpose.msra.mxu0 %v1664_v33  ;;  %2027 = vmatpush.xpose.msra.mxu1 %v1665_v60 }
 0x4af   : > { %1987 = vmatpush.xpose.msra.mxu0 %v1648_v54  ;;  %2028 = vmatpush.xpose.msra.mxu1 %v1649_v50 }
 0x4b2   : > { %1988 = vmatmul.f32.vlgmr.msra.gmra.mxu0 %v3835_v15  ;;  %2029 = vmatmul.f32.vlgmr.msra.gmra.mxu1 %v3838_v32 }
 0x4b7   : > { %v1907_v55 = vpop.f32.mrf.mxu0  ;;  %v1948_v17 = vpop.f32.mrf.mxu1 }
 0x4b8   : > { %v1949_v45 = vadd.f32 %v1948_v17, %v1907_v55  ;;  %v2556_v17 = vld [vmem:[%s2805_s21 + $0x28] sm:$0xff] }
 0x4ba   : > { %v2061_v19 = vmul.f32 %v4194_v37, %v1949_v45  ;;  %1991 = vmatmul.f32.gmra.mxu0 %v3845_v24  ;;  %2032 = vmatmul.f32.gmra.mxu1 %v3848_v18  ;;  %v2547_v24 = vld [vmem:[%s2805_s21 + $0x10] sm:$0xff] }
 0x4bc   : > { %v2077_v28 = vadd.f32 %v2546_v7, %v2061_v19 }
 0x4be   : > { %2093 = vst [vmem:[%s4202_s13] sm:$0xff] %v2077_v28 }
 0x4bf   : > { %v1910_v15 = vpop.f32.mrf.mxu0  ;;  %v1951_v32 = vpop.f32.mrf.mxu1 }
 0x4c0   : > { %v1952_v25 = vadd.f32 %v1951_v32, %v1910_v15  ;;  %v2557_v32 = vld [vmem:[%s2805_s21 + $0x38] sm:$0xff] }
 0x4c2   : > { %v2063_v22 = vmul.f32 %v4194_v37, %v1952_v25  ;;  %1994 = vmatmul.f32.gmra.mxu0 %v3855_v1  ;;  %2035 = vmatmul.f32.gmra.mxu1 %v3858_v29 }
 0x4c4   : > { %v2079_v18 = vadd.f32 %v2547_v24, %v2063_v22 }
 0x4c6   : > { %2095 = vst [vmem:[%s4202_s13 + $0x10] sm:$0xff] %v2079_v18 }
 0x4c7   : > { %v1913_v36 = vpop.f32.mrf.mxu0  ;;  %v1954_v57 = vpop.f32.mrf.mxu1 }
 0x4c8   : > { %v1955_v52 = vadd.f32 %v1954_v57, %v1913_v36  ;;  %v2558_v57 = vld [vmem:[%s2805_s21 + $0x48] sm:$0xff] }
 0x4ca   : > { %v2065_v56 = vmul.f32 %v4194_v37, %v1955_v52  ;;  %1997 = vmatmul.f32.gmra.mxu0 %v3866_v3  ;;  %2038 = vmatmul.f32.gmra.mxu1 %v3868_v20 }
 0x4cc   : > { %v2081_v2 = vadd.f32 %v2548_v58, %v2065_v56 }
 0x4ce   : > { %2097 = vst [vmem:[%s4202_s13 + $0x20] sm:$0xff] %v2081_v2 }
 0x4cf   : > { %v1916_v1 = vpop.f32.mrf.mxu0  ;;  %v1957_v23 = vpop.f32.mrf.mxu1 }
 0x4d0   : > { %v1958_v29 = vadd.f32 %v1957_v23, %v1916_v1  ;;  %v2559_v23 = vld [vmem:[%s2805_s21 + $0x58] sm:$0xff] }
 0x4d2   : > { %v2067_v14 = vmul.f32 %v4194_v37, %v1958_v29  ;;  %2000 = vmatmul.f32.gmra.mxu0 %v3959_v51  ;;  %2041 = vmatmul.f32.gmra.mxu1 %v3961_v21 }
 0x4d4   : > { %v2083_v44 = vadd.f32 %v2549_v30, %v2067_v14 }
 0x4d6   : > { %2099 = vst [vmem:[%s4202_s13 + $0x30] sm:$0xff] %v2083_v44 }
 0x4da   : > { %2003 = vmatmul.f32.gmra.mxu0 %v3995_v47  ;;  %2044 = vmatmul.f32.gmra.mxu1 %v3997_v10 }
 0x4e2   : > { %2006 = vmatmul.f32.gmra.mxu0 %v4054_v12  ;;  %2047 = vmatmul.f32.gmra.mxu1 %v4056_v43 }
 0x4ea   : > { %2009 = vmatmul.f32.gmra.mxu0 %v4090_v6  ;;  %2050 = vmatmul.f32.gmra.mxu1 %v4092_v35 }
 0x4ec   : > { %v1919_v3 = vpop.f32.mrf.mxu0  ;;  %v1960_v20 = vpop.f32.mrf.mxu1 }
 0x4ed   : > { %v1961_v51 = vadd.f32 %v1960_v20, %v1919_v3  ;;  %v2560_v20 = vld [vmem:[%s2805_s21 + $0x68] sm:$0xff] }
 0x4ef   : > { %v2069_v21 = vmul.f32 %v4194_v37, %v1961_v51 }
 0x4f1   : > { %v2085_v47 = vadd.f32 %v2550_v41, %v2069_v21 }
 0x4f3   : > { %2101 = vst [vmem:[%s4202_s13 + $0x40] sm:$0xff] %v2085_v47 }
 0x4f4   : > { %v1922_v10 = vpop.f32.mrf.mxu0  ;;  %v1963_v27 = vpop.f32.mrf.mxu1 }
 0x4f5   : > { %v1964_v12 = vadd.f32 %v1963_v27, %v1922_v10  ;;  %v2561_v27 = vld [vmem:[%s2805_s21 + $0x78] sm:$0xff] }
 0x4f7   : > { %v2071_v43 = vmul.f32 %v4194_v37, %v1964_v12 }
 0x4f9   : > { %v2087_v6 = vadd.f32 %v2551_v16, %v2071_v43 }
 0x4fb   : > { %2103 = vst [vmem:[%s4202_s13 + $0x50] sm:$0xff] %v2087_v6 }
 0x4fc   : > { %v1925_v35 = vpop.f32.mrf.mxu0  ;;  %v1966_v38 = vpop.f32.mrf.mxu1 }
 0x4fd   : > { %v1967_v63 = vadd.f32 %v1966_v38, %v1925_v35 }
 0x4ff   : > { %v2073_v42 = vmul.f32 %v4194_v37, %v1967_v63 }
 0x501   : > { %v2089_v61 = vadd.f32 %v2552_v34, %v2073_v42 }
 0x503   : > { %2105 = vst [vmem:[%s4202_s13 + $0x60] sm:$0xff] %v2089_v61 }
 0x504   : > { %v1928_v13 = vpop.f32.mrf.mxu0  ;;  %v1969_v11 = vpop.f32.mrf.mxu1 }
 0x505   : > { %v1970_v0 = vadd.f32 %v1969_v11, %v1928_v13 }
 0x507   : > { %v2075_v48 = vmul.f32 %v4194_v37, %v1970_v0 }
 0x509   : > { %v2091_v9 = vadd.f32 %v2553_v49, %v2075_v48 }
 0x50b   : > { %2107 = vst [vmem:[%s4202_s13 + $0x70] sm:$0xff] %v2091_v9 }
 0x52f   : > { %v1989_v53 = vpop.f32.mrf.mxu0  ;;  %v2030_v46 = vpop.f32.mrf.mxu1 }
 0x530   : > { %v2031_v40 = vadd.f32 %v2030_v46, %v1989_v53 }
 0x532   : > { %v2062_v59 = vmul.f32 %v4194_v37, %v2031_v40 }
 0x534   : > { %v2078_v5 = vadd.f32 %v2554_v26, %v2062_v59 }
 0x536   : > { %2094 = vst [vmem:[%s4202_s13 + $0x8] sm:$0xff] %v2078_v5 }
 0x537   : > { %v1992_v8 = vpop.f32.mrf.mxu0  ;;  %v2033_v4 = vpop.f32.mrf.mxu1 }
 0x538   : > { %v2034_v33 = vadd.f32 %v2033_v4, %v1992_v8 }
 0x53a   : > { %v2064_v60 = vmul.f32 %v4194_v37, %v2034_v33 }
 0x53c   : > { %v2080_v62 = vadd.f32 %v2555_v39, %v2064_v60 }
 0x53e   : > { %2096 = vst [vmem:[%s4202_s13 + $0x18] sm:$0xff] %v2080_v62 }
 0x53f   : > { %v1995_v54 = vpop.f32.mrf.mxu0  ;;  %v2036_v31 = vpop.f32.mrf.mxu1 }
 0x540   : > { %v2037_v50 = vadd.f32 %v2036_v31, %v1995_v54 }
 0x542   : > { %v2066_v55 = vmul.f32 %v4194_v37, %v2037_v50 }
 0x544   : > { %v2082_v45 = vadd.f32 %v2556_v17, %v2066_v55 }
 0x546   : > { %2098 = vst [vmem:[%s4202_s13 + $0x28] sm:$0xff] %v2082_v45 }
 0x547   : > { %v1998_v19 = vpop.f32.mrf.mxu0  ;;  %v2039_v7 = vpop.f32.mrf.mxu1 }
 0x548   : > { %v2040_v28 = vadd.f32 %v2039_v7, %v1998_v19 }
 0x54a   : > { %v2068_v15 = vmul.f32 %v4194_v37, %v2040_v28 }
 0x54c   : > { %v2084_v25 = vadd.f32 %v2557_v32, %v2068_v15 }
 0x54e   : > { %2100 = vst [vmem:[%s4202_s13 + $0x38] sm:$0xff] %v2084_v25 }
 0x54f   : > { %v2001_v22 = vpop.f32.mrf.mxu0  ;;  %v2042_v24 = vpop.f32.mrf.mxu1 }
 0x550   : > { %v2043_v18 = vadd.f32 %v2042_v24, %v2001_v22 }
 0x552   : > { %v2070_v36 = vmul.f32 %v4194_v37, %v2043_v18 }
 0x554   : > { %v2086_v52 = vadd.f32 %v2558_v57, %v2070_v36 }
 0x556   : > { %2102 = vst [vmem:[%s4202_s13 + $0x48] sm:$0xff] %v2086_v52 }
 0x557   : > { %v2004_v56 = vpop.f32.mrf.mxu0  ;;  %v2045_v58 = vpop.f32.mrf.mxu1 }
 0x558   : > { %v2046_v2 = vadd.f32 %v2045_v58, %v2004_v56 }
 0x55a   : > { %v2072_v1 = vmul.f32 %v4194_v37, %v2046_v2 }
 0x55c   : > { %v2088_v29 = vadd.f32 %v2559_v23, %v2072_v1 }
 0x55e   : > { %2104 = vst [vmem:[%s4202_s13 + $0x58] sm:$0xff] %v2088_v29 }
 0x55f   : > { %v2007_v14 = vpop.f32.mrf.mxu0  ;;  %v2048_v30 = vpop.f32.mrf.mxu1 }
 0x560   : > { %v2049_v44 = vadd.f32 %v2048_v30, %v2007_v14 }
 0x562   : > { %v2074_v3 = vmul.f32 %v4194_v37, %v2049_v44 }
 0x564   : > { %v2090_v51 = vadd.f32 %v2560_v20, %v2074_v3 }
 0x566   : > { %2106 = vst [vmem:[%s4202_s13 + $0x68] sm:$0xff] %v2090_v51 }
 0x567   : > { %v2010_v21 = vpop.f32.mrf.mxu0  ;;  %v2051_v41 = vpop.f32.mrf.mxu1 }
 0x568   : > { %v2052_v47 = vadd.f32 %v2051_v41, %v2010_v21 }
 0x56a   : > { %v2076_v10 = vmul.f32 %v4194_v37, %v2052_v47 }
 0x56c   : > { %v2092_v12 = vadd.f32 %v2561_v27, %v2076_v10 }
 0x56e   : > { %2108 = vst [vmem:[%s4202_s13 + $0x78] sm:$0xff] %v2092_v12 }
 0x56f   : > { %2619 = shalt.err (!%p2616_p4)
}
 0x570   : > { %s2663_s27 = smov 256   ;;  %s2664_s21 = smov 16  }
 0x571   : > { %2300 = dma.vmem_to_hbm [thread:$0]  (%p2763_p11), %s2123_s24, 2048, %s2125_s20, %s2110_s7, %s2663_s27, %s2663_s27, %s2664_s21  }
 0x572 PF: > { %s2139_s13 = sand.u32 1, %s2646_s29   ;;  %p4500_p7 = scmp.ge.s32.totalorder %s2658_s10, 2 }
 0x573   : > { %s2140_s22 = scalar_lea.sflag [#allocation5], %s2139_s13 }
 0x574   : > { %p2307_p5 = pnand %p4500_p7, %p2767_p12 }
 0x576   : > { %p2308_p8 = pneg %p2307_p5 }
 0x578   : > { %2641 = dma.done.wait (%p2308_p8), %s2140_s22, 2048  }
 0x579   : > { %2643 = vsyncadd (%p2308_p8), %s2140_s22, 4294965248  ;;  %s4501_s16 = sld [smem:[#allocation9_spill]]  ;;  %p23_p10 = scmp.ge.s32.totalorder %s2738_s12, 4  }
 0x57a   : > { %s4502_s29 = smov %s2650_s30  ;;  %s4503_s30 = smov %s2654_s9 }
 0x57b   : > { %s4505_s10 = smov %s2738_s12  ;;  %25 = sbr.rel (!%p23_p10) target bundleno = 8 (0x8), region = 97 }
 0x57f   : > { %s4504_s9 = smov %s4501_s16 }
 0x580   :  { %2146 = vsyncpa [#allocation4], 1 }
 0x581   :  { %2148 = vsyncpa [#allocation4 + $0x1], 1 }
 0x582   :  { %2149 = vsyncpa [#allocation5], 1 }
 0x583   :  { %2151 = vsyncpa [#allocation5 + $0x1], 1 }

</bundles_post_ra>
